<compile_context>
chip_gen: v7x
topology: tpu7x:2x2x1
jax: 0.10.0
libtpu: 0.0.40
codegen_flags: <defaults>
</compile_context>

<pallas_src>
import math

import jax
import jax.numpy as jnp
import numpy as np
from jax.experimental import pallas as pl
from jax.experimental.pallas import tpu as pltpu


def _pe_add_kernel(x_ref, o_ref, pe_ref):
    # x_ref / o_ref: (seq_tile, D) tile of the (B, S, D) input (batch squeezed).
    # pe_ref:        (seq_tile, D) f32 VMEM scratch caching the PE tile.
    ts, d = x_ref.shape
    si = pl.program_id(0)  # sequence-block index (outer)
    bi = pl.program_id(1)  # batch index (inner) -- PE reused across it

    @pl.when(bi == 0)
    def _compute_pe():
        # Column-dependent quantities hoisted to a single (1, D) row.
        col = jax.lax.broadcasted_iota(jnp.int32, (1, d), 1)
        two_i = (col & ~1).astype(jnp.float32)                 # 2 * (col // 2)
        freq = jnp.exp(two_i * (-math.log(10000.0) / d))        # (1, D): D exps / tile
        phase = (col & 1).astype(jnp.float32) * (math.pi / 2.0)  # cos(x) = sin(x + pi/2)
        pos = (si * ts + jax.lax.broadcasted_iota(jnp.int32, (ts, 1), 0)).astype(
            jnp.float32
        )
        # One EUP sin per element (was sin + cos + select).
        pe_ref[...] = jnp.sin(pos * freq + phase)

    # f32 accumulate, single rounding to the output dtype (dropout p=0 -> identity).
    o_ref[...] = (x_ref[...].astype(jnp.float32) + pe_ref[...]).astype(o_ref.dtype)


def _choose_seq_tile(s, d, itemsize, vmem_budget_bytes):
    """Largest seq tile whose live VMEM (2 in + 2 out double-buffered + f32 scratch)
    stays under the budget; must divide s and be a multiple of 8 unless it is s."""
    per_row = d * (4 * itemsize + 4)
    max_rows = max(8, vmem_budget_bytes // per_row)
    if s <= max_rows:
        return s
    t = (max_rows // 8) * 8
    while t >= 8:
        if s % t == 0:
            return t
        t -= 8
    return s  # pathological (no suitable divisor): fall back to full sequence


def positional_encoding(x, *, seq_tile=None, vmem_budget_bytes=12 * 1024 * 1024):
    """x: (B, S, D) float array. Returns x + sinusoidal PE (dropout p=0)."""
    b, s, d = x.shape
    itemsize = jnp.dtype(x.dtype).itemsize
    if seq_tile is None:
        seq_tile = _choose_seq_tile(s, d, itemsize, vmem_budget_bytes)
    assert s % seq_tile == 0, "seq_tile must divide the sequence length"
    n_seq_blocks = s // seq_tile

    # Bandwidth-only op: flops = one add/elem, transcendentals = what we actually
    # execute (one sin per PE element + one exp row per seq block), bytes = read+write x.
    cost = pl.CostEstimate(
        flops=b * s * d,
        transcendentals=s * d + n_seq_blocks * d,
        bytes_accessed=2 * b * s * d * itemsize,
    )

    in_spec = pl.BlockSpec((pl.Squeezed(), seq_tile, d), lambda si, bi: (bi, si, 0))
    out_spec = pl.BlockSpec((pl.Squeezed(), seq_tile, d), lambda si, bi: (bi, si, 0))

    return pl.pallas_call(
        _pe_add_kernel,
        out_shape=jax.ShapeDtypeStruct((b, s, d), x.dtype),
        grid_spec=pltpu.PrefetchScalarGridSpec(
            num_scalar_prefetch=0,
            grid=(n_seq_blocks, b),  # seq outer, batch inner -> PE cached across batch
            in_specs=[in_spec],
            out_specs=out_spec,
            scratch_shapes=[pltpu.VMEM((seq_tile, d), jnp.float32)],
        ),
        compiler_params=pltpu.CompilerParams(
            dimension_semantics=("parallel", "arbitrary"),
            vmem_limit_bytes=32 * 1024 * 1024,
        ),
        input_output_aliases={0: 0},  # in-place add: no second (B,S,D) HBM buffer
        cost_estimate=cost,
    )(x)


def _reference(x_np):
    """Pure-numpy (float64) reference mirroring the PyTorch module."""
    _, s, d = x_np.shape
    denominator = np.exp(np.arange(0, d, 2) * (-math.log(10000.0) / d))
    pos = np.arange(0, s)[:, None]
    pe = np.zeros((s, d), dtype=np.float64)
    pe[:, 0::2] = np.sin(pos * denominator)
    pe[:, 1::2] = np.cos(pos * denominator)
    return x_np.astype(np.float64) + pe[None]


if __name__ == "__main__":
    # Main test: module-default dim_model=512 (lane-dense last dim), small B/S.
    B, S, D = 2, 16, 512
    key = jax.random.PRNGKey(0)
    x = jax.random.normal(key, (B, S, D), dtype=jnp.float32)

    ref = _reference(np.asarray(x))
    out = jax.block_until_ready(positional_encoding(x))
    np.testing.assert_allclose(np.asarray(out), ref, rtol=1e-4, atol=1e-4)

    # Secondary test: small non-lane-aligned dim + bf16 input path.
    x2 = jax.random.normal(jax.random.PRNGKey(1), (2, 8, 32), dtype=jnp.bfloat16)
    ref2 = _reference(np.asarray(x2).astype(np.float32))
    out2 = jax.block_until_ready(positional_encoding(x2))
    np.testing.assert_allclose(
        np.asarray(out2).astype(np.float32), ref2, rtol=5e-2, atol=5e-2
    )

    print("KERNEL_OK")
</pallas_src>

<mosaic_0001>
module attributes {stable_mosaic.version = 11 : i64} {
  func.func @_pe_add_kernel(%arg0: i32, %arg1: i32, %arg2: memref<1x16x512xf32, #tpu.memory_space<vmem>>, %arg3: memref<1x16x512xf32, #tpu.memory_space<vmem>>, %arg4: memref<16x512xf32, #tpu.memory_space<vmem>>) attributes {dimension_semantics = [#tpu.dimension_semantics<parallel>, #tpu.dimension_semantics<arbitrary>], iteration_bounds = array<i64: 1, 2>, scalar_prefetch = 0 : i64, scratch_operands = 1 : i64, tpu.core_type = #tpu.core_type<tc>, window_params = [{transform_indices = @transform_0, window_bounds = array<i64: 1, 16, 512>}, {transform_indices = @transform_1, window_bounds = array<i64: 1, 16, 512>}]} {
    %c0_i32 = arith.constant 0 : i32
    %0 = arith.cmpi eq, %arg1, %c0_i32 : i32
    %1 = arith.extui %0 : i1 to i32
    %c0_i32_0 = arith.constant 0 : i32
    %2 = arith.cmpi ne, %1, %c0_i32_0 : i32
    scf.if %2 {
      %10 = tpu.iota {dimensions = array<i32: 1>} : vector<1x512xi32>
      %c-2_i32 = arith.constant -2 : i32
      %11 = vector.broadcast %c-2_i32 : i32 to vector<1x512xi32>
      %12 = arith.andi %10, %11 : vector<1x512xi32>
      %13 = arith.sitofp %12 : vector<1x512xi32> to vector<1x512xf32>
      %cst = arith.constant -0.0179889463 : f32
      %14 = vector.broadcast %cst : f32 to vector<1x512xf32>
      %15 = arith.mulf %13, %14 : vector<1x512xf32>
      %16 = math.exp %15 : vector<1x512xf32>
      %c1_i32 = arith.constant 1 : i32
      %17 = vector.broadcast %c1_i32 : i32 to vector<1x512xi32>
      %18 = arith.andi %10, %17 : vector<1x512xi32>
      %19 = arith.sitofp %18 : vector<1x512xi32> to vector<1x512xf32>
      %cst_8 = arith.constant 1.57079637 : f32
      %20 = vector.broadcast %cst_8 : f32 to vector<1x512xf32>
      %21 = arith.mulf %19, %20 : vector<1x512xf32>
      %c16_i32 = arith.constant 16 : i32
      %22 = arith.muli %arg0, %c16_i32 : i32
      %23 = tpu.iota {dimensions = array<i32: 0>} : vector<16x1xi32>
      %24 = vector.broadcast %22 : i32 to vector<16x1xi32>
      %25 = arith.addi %24, %23 : vector<16x1xi32>
      %26 = arith.sitofp %25 : vector<16x1xi32> to vector<16x1xf32>
      %27 = vector.broadcast %26 : vector<16x1xf32> to vector<16x512xf32>
      %28 = vector.broadcast %16 : vector<1x512xf32> to vector<16x512xf32>
      %29 = arith.mulf %27, %28 : vector<16x512xf32>
      %30 = vector.broadcast %21 : vector<1x512xf32> to vector<16x512xf32>
      %31 = arith.addf %29, %30 : vector<16x512xf32>
      %32 = math.sin %31 : vector<16x512xf32>
      %c0_9 = arith.constant 0 : index
      %c0_10 = arith.constant 0 : index
      %33 = vector.load %arg4[%c0_9, %c0_10] : memref<16x512xf32, #tpu.memory_space<vmem>>, vector<16x512xf32>
      tpu.vector_store %arg4[%c0_9, %c0_10], %32 {strides = array<i32>} : memref<16x512xf32, #tpu.memory_space<vmem>>, vector<16x512xf32>,
    } else {
    }
    %c0 = arith.constant 0 : index
    %c0_1 = arith.constant 0 : index
    %c0_2 = arith.constant 0 : index
    %3 = vector.load %arg2[%c0, %c0_1, %c0_2] : memref<1x16x512xf32, #tpu.memory_space<vmem>>, vector<1x16x512xf32>
    %4 = vector.shape_cast %3 : vector<1x16x512xf32> to vector<16x512xf32>
    %c0_3 = arith.constant 0 : index
    %c0_4 = arith.constant 0 : index
    %5 = vector.load %arg4[%c0_3, %c0_4] : memref<16x512xf32, #tpu.memory_space<vmem>>, vector<16x512xf32>
    %6 = arith.addf %4, %5 : vector<16x512xf32>
    %c0_5 = arith.constant 0 : index
    %c0_6 = arith.constant 0 : index
    %c0_7 = arith.constant 0 : index
    %7 = vector.load %arg3[%c0_5, %c0_6, %c0_7] : memref<1x16x512xf32, #tpu.memory_space<vmem>>, vector<1x16x512xf32>
    %8 = vector.shape_cast %7 : vector<1x16x512xf32> to vector<16x512xf32>
    %9 = vector.shape_cast %6 : vector<16x512xf32> to vector<1x16x512xf32>
    tpu.vector_store %arg3[%c0_5, %c0_6, %c0_7], %9 {strides = array<i32>} : memref<1x16x512xf32, #tpu.memory_space<vmem>>, vector<1x16x512xf32>,
    return
  }
  func.func @transform_0(%arg0: i32, %arg1: i32) -> (i32, i32, i32) {
    %c0_i32 = arith.constant 0 : i32
    %c0_i32_0 = arith.constant 0 : i32
    return %arg1, %arg0, %c0_i32 : i32, i32, i32
  }
  func.func @transform_1(%arg0: i32, %arg1: i32) -> (i32, i32, i32) {
    %c0_i32 = arith.constant 0 : i32
    %c0_i32_0 = arith.constant 0 : i32
    return %arg1, %arg0, %c0_i32 : i32, i32, i32
  }
}

</mosaic_0001>

<bundles_post_ra>
// kernel: tpu_custom_call.1
= control target key start
LH: loop header
LB: loop body
LE: loop exit
PB: predicated region body
PF: predicated region fallthrough
CT: control target
= control target key end

     0   :  { %6 = vsyncpa [#allocation4], 0  ;;  %s2284_s0 = inlined_call_operand.hbm [shape: f32[2,16,512], index: 0, kind: input, shape index: {}, may-alias: {0,1}]   ;;  %s2285_s1 = inlined_call_operand.hbm [shape: f32[2,16,512], index: 1, kind: output, shape index: {}, may-alias: {0,1}]  }
   0x1   :  { %8 = vsyncpa [#allocation4 + $0x1], 0 }
   0x2   :  { %9 = vsyncpa [#allocation5], 0 }
   0x3   :  { %11 = vsyncpa [#allocation5 + $0x1], 0  ;;  %s1528_s6 = smov 0   ;;  %s1530_s7 = smov 0  }
   0x4   :  { %s1532_s8 = smov 0   ;;  %s1534_s9 = smov 0  }
   0x5   :  { %s1536_s10 = smov 0   ;;  %s1538_s11 = smov 0  }
   0x6 LB: > { %s1198_s12 = sadd.s32 4294967295, %s1504_s11   ;;  %s1199_s13 = sadd.s32 4294967294, %s1504_s11   ;;  %s1504_s11 = sphi %s1538_s11, %s17_s11   ;;  %s1500_s10 = sphi %s1536_s10, %s2312_s10   ;;  %s1496_s9 = sphi %s1534_s9, %s2311_s9   ;;  %s1492_s8 = sphi %s1532_s8, %s2310_s8   ;;  %s1488_s7 = sphi %s1530_s7, %s2309_s7   ;;  %s1484_s6 = sphi %s1528_s6, %s2308_s6  }
   0x7   : > { %s26_s14 = sadd.s32 1, %s1500_s10  ;;  %s38_s15 = sadd.s32 1, %s1492_s8 }
   0x8   : > { %p27_p0 = scmp.ge.s32.totalorder %s26_s14, 2  ;;  %p45_p1 = scmp.ne.s32.totalorder %s1492_s8, %s1488_s7 }
   0x9   : > { %p46_p2 = scmp.eq.s32.totalorder %s1504_s11, 0  ;;  %p51_p3 = scmp.ne.s32.totalorder %s1488_s7, %s1484_s6 }
   0xa   : > { %s2314_s14 = smov (%p27_p0, %s26_s14), 0  ;;  %p52_p5 = scmp.eq.s32.totalorder %s1198_s12, 0 }
   0xb   : > { %p1569_p4 = por %p46_p2, %p45_p1  ;;  %s33_s17 = ssub.s32 %s1500_s10, %s2314_s14 }
   0xc   : > { %p77_p6 = scmp.eq.s32.totalorder %s1198_s12, 1  ;;  %p36_p7 = scmp.eq.s32.totalorder %s33_s17, 0 }
   0xd   : > { %p1575_p8 = por %p52_p5, %p51_p3  ;;  %p83_p10 = scmp.eq.s32.totalorder %s1199_s13, 1 }
   0xe   : > { %p1579_p9 = por %p77_p6, %p45_p1  ;;  %p1292_p13 = scmp.lt.s32.totalorder %s1504_s11, 2 }
   0xf   : > { %s1584_s20 = scalar_select %p36_p7, %s1492_s8, %s38_s15  }
  0x10   : > { %s2289_s19 = scalar_select %p1579_p9, 1, 0 }
  0x11   : > { %p1586_p11 = por %p83_p10, %p51_p3  ;;  %s103_s22 = sand.u32 1, %s1492_s8  }
  0x12   : > { %s1202_s23 = sshll.u32 %s103_s22, 6  ;;  %s1246_s24 = sshll.u32 %s1500_s10, 10 }
  0x13   : > { %s2290_s21 = scalar_select %p1586_p11, 1, 0 }
  0x14   : > { %s1597_s27 = scalar_lea.hbm %s2284_s0, %s1246_s24  ;;  %s107_s28 = scalar_lea.vmem [#allocation3], %s1202_s23 }
  0x15   : > { %s117_s29 = sshll.u32 %s107_s28, 4  ;;  %p1603_p0 = pnand %p1292_p13, %p1569_p4  ;;  %s1599_s29 = int_to_ptr.vmem [resolvable:$true] %s117_s29 }
  0x16   : > { %s1608_s2 = scalar_lea.sflag [#allocation4], %s103_s22  ;;  %s1392_s3 = scalar_lea.hbm %s1597_s27, 1024 }
  0x17   : > { %p1393_p2 = scmp.ne.s32.totalorder %s1597_s27, %s1392_s3  ;;  %p1394_p3 = pneg %p1603_p0 }
  0x18   : > { %s1397_s12 = scalar_lea.hbm %s2284_s0, 2048  ;;  %p1398_p4 = scmp.lt.u32.totalorder %s1597_s27, %s2284_s0 }
  0x19   : > { %p1395_p5 = pnand %p1394_p3, %p1393_p2  ;;  %p1399_p7 = scmp.lt.u32.totalorder %s1397_s12, %s1392_s3 }
  0x1a   : > { %p1401_p13 = scmp.lt.u32.totalorder %s1392_s3, %s1597_s27 }
  0x1b   : > { %p1396_p6 = pneg %p1395_p5  ;;  %p1400_p10 = por %p1399_p7, %p1398_p4 }
  0x1d   : > { %p1402_p12 = por %p1401_p13, %p1400_p10 }
  0x1f   : > { %p1403_p1 = pnand %p1402_p12, %p1396_p6 }
  0x21   : > { %1406 = shalt.err (!%p1403_p1)
}
  0x22   : > { %s1407_s16 = scalar_lea.vmem %s1599_s29, 1024  ;;  %s1506_s17 = smov [#allocation3]  }
  0x23   : > { %p1408_p2 = scmp.ne.s32.totalorder %s1599_s29, %s1407_s16  ;;  %s1412_s22 = sshll.u32 %s1506_s17, 4  ;;  %s1413_s22 = int_to_ptr.vmem [resolvable:$false] %s1412_s22 }
  0x24   : > { %s1414_s23 = scalar_lea.vmem %s1413_s22, 2048  ;;  %p1415_p9 = scmp.lt.s32.totalorder %s1599_s29, %s1413_s22 }
  0x25   : > { %p1410_p5 = pnand %p1408_p2, %p1394_p3  ;;  %p1416_p4 = scmp.lt.s32.totalorder %s1414_s23, %s1407_s16 }
  0x27   : > { %p1411_p11 = pneg %p1410_p5  ;;  %p1417_p7 = por %p1416_p4, %p1415_p9 }
  0x29   : > { %p1418_p10 = pnand %p1417_p7, %p1411_p11 }
  0x2b   : > { %1421 = shalt.err (!%p1418_p10)
}
  0x2c   : > { %s1507_s24 = smov 512   ;;  %s1508_s25 = smov 32  }
  0x2d   : > { %1287 = dma.hbm_to_vmem [thread:$0]  (!%p1603_p0), %s1597_s27, 1024, %s1599_s29, %s1608_s2, %s1507_s24, %s1507_s24, %s1508_s25  }
  0x2e   : > { %p125_p12 = scmp.lt.s32.totalorder %s1504_s11, 3  ;;  %p2292_p1 = scmp.ge.s32.totalorder %s1504_s11, 1 }
  0x30   : > { %p126_p3 = pnand %p2292_p1, %p125_p12 }
  0x31   : > { %s1640_s26 = sand.u32 (!%p126_p3), 1, %s1488_s7  }
  0x32   : > { %129 = sbr.rel (%p126_p3) target bundleno = 348 (0x15c), region = 24  ;;  %s1206_s28 = sshll.u32 (!%p126_p3), %s1640_s26, 6 }
  0x33   : > { %s132_s3 = scalar_lea.sflag (!%p126_p3), [#allocation4], %s1640_s26  ;;  %s1644_s4 = scalar_lea.vmem (!%p126_p3), [#allocation3], %s1206_s28 }
  0x39   : > { %1475 = dma.done.wait (%p1575_p8), %s132_s3, 1024  }
  0x3a   : > { %1477 = vsyncadd (%p1575_p8), %s132_s3, 4294966272  ;;  %s1650_s27 = scalar_lea.vmem [#allocation6], %s1206_s28  ;;  %p1208_p9 = scmp.ne.s32.totalorder %s1496_s9, 0 }
  0x3b   : > { %v160_v0 = vlaneseq (!%p1208_p9) }
  0x3c   : > { %159 = sbr.rel (%p1208_p9) target bundleno = 322 (0x142), region = 32 }
  0x3d   : > { %v161_v1 = vand.u32 (!%p1208_p9), 127, %v160_v0  ;;  %v199_v18 = vshrl.u32 (!%p1208_p9), %v160_v0, 7 }
  0x3f   : > { %v162_v2 = vadd.s32 (!%p1208_p9), 128, %v161_v1  ;;  %v163_v3 = vadd.s32 (!%p1208_p9), 256, %v161_v1  ;;  %v164_v4 = vadd.s32 (!%p1208_p9), 384, %v161_v1  ;;  %v165_v5 = vand.u32 (!%p1208_p9), 4294967294, %v161_v1 }
  0x40   : > { %v185_v22 = vand.u32 (!%p1208_p9), 1, %v161_v1  ;;  %v200_v25 = vadd.s32 (!%p1208_p9), 8, %v199_v18  ;;  %v204_v30 = vcvt.s32.f32 (!%p1208_p9), %v199_v18  ;;  %v1509_v18 = vmov (!%p1208_p9), 683565275  }
  0x41   : > { %v166_v6 = vand.u32 (!%p1208_p9), 4294967294, %v162_v2  ;;  %v167_v7 = vand.u32 (!%p1208_p9), 4294967294, %v163_v3  ;;  %v168_v8 = vand.u32 (!%p1208_p9), 4294967294, %v164_v4  ;;  %v169_v9 = vcvt.s32.f32 (!%p1208_p9), %v165_v5 }
  0x42   : > { %v186_v23 = vand.u32 (!%p1208_p9), 1, %v162_v2  ;;  %v187_v24 = vand.u32 (!%p1208_p9), 1, %v163_v3  ;;  %v188_v26 = vand.u32 (!%p1208_p9), 1, %v164_v4  ;;  %v189_v27 = vcvt.s32.f32 (!%p1208_p9), %v185_v22 }
  0x43   : > { %v170_v10 = vcvt.s32.f32 %v166_v6  ;;  %v171_v11 = vcvt.s32.f32 %v167_v7  ;;  %v172_v12 = vcvt.s32.f32 %v168_v8  ;;  %v173_v13 = vmul.f32 -0.017988946, %v169_v9 }
  0x44   : > { %v190_v28 = vcvt.s32.f32 %v186_v23  ;;  %v191_v29 = vcvt.s32.f32 %v187_v24  ;;  %v205_v31 = vcvt.s32.f32 %v200_v25  ;;  %v192_v32 = vcvt.s32.f32 %v188_v26 }
  0x45   : > { %v174_v14 = vmul.f32 -0.017988946, %v170_v10  ;;  %v175_v15 = vmul.f32 -0.017988946, %v171_v11  ;;  %v176_v16 = vmul.f32 -0.017988946, %v172_v12 }
  0x46   : > { %v177_v17 = vmul.f32 1.442695, %v173_v13  ;;  %v193_v33 = vmul.f32 1.5707964, %v189_v27  ;;  %v194_v35 = vmul.f32 1.5707964, %v190_v28 }
  0x47   : > { %v179_v19 = vmul.f32 1.442695, %v174_v14  ;;  %v181_v20 = vmul.f32 1.442695, %v175_v15  ;;  %v183_v21 = vmul.f32 1.442695, %v176_v16 }
  0x48   : > { %1352 = vpow2.f32 %v177_v17  ;;  %v195_v37 = vmul.f32 1.5707964, %v191_v29  ;;  %v196_v41 = vmul.f32 1.5707964, %v192_v32  ;;  %v1511_v22 = vmov 2131351028  }
  0x49   : > { %1354 = vpow2.f32 %v179_v19  ;;  %v1512_v24 = vmov 2102212464   ;;  %v1513_v26 = vmov 920167782  }
  0x4a   : > { %1356 = vpow2.f32 %v181_v20  ;;  %v1510_v20 = vmov 2475754826  }
  0x4b   : > { %1358 = vpow2.f32 %v183_v21 }
  0x52   : > { %v1353_v34 = vpop.eup %1352 }
  0x53   : > { %v1355_v36 = vpop.eup %1354  ;;  %v206_v38 = vmul.f32 %v1353_v34, %v204_v30  ;;  %v210_v39 = vmul.f32 %v1353_v34, %v205_v31  ;;  %v1514_v34 = vmov 1326507024  }
  0x54   : > { %v1357_v40 = vpop.eup %1356  ;;  %v207_v42 = vmul.f32 %v1355_v36, %v204_v30  ;;  %v211_v43 = vmul.f32 %v1355_v36, %v205_v31 }
  0x55   : > { %v1359_v44 = vpop.eup %1358  ;;  %v208_v45 = vmul.f32 %v1357_v40, %v204_v30  ;;  %v212_v46 = vmul.f32 %v1357_v40, %v205_v31  ;;  %v1653_v47 = vadd.f32 %v206_v38, %v193_v33  ;;  %v1655_v48 = vadd.f32 %v210_v39, %v193_v33 }
  0x56   : > { %v213_v49 = vmul.f32 %v1359_v44, %v205_v31  ;;  %v1657_v50 = vadd.f32 %v207_v42, %v194_v35  ;;  %v1659_v51 = vadd.f32 %v211_v43, %v194_v35  ;;  %v209_v1 = vmul.f32 %v1359_v44, %v204_v30 }
  0x57   : > { %v1661_v52 = vadd.f32 %v212_v46, %v195_v37  ;;  %v222_v53 = vand.u32 2147483647, %v1653_v47  ;;  %v1664_v54 = vadd.f32 %v208_v45, %v195_v37  ;;  %v225_v56 = vand.u32 2139095040, %v1653_v47 }
  0x58   : > { %v1666_v55 = vadd.f32 %v213_v49, %v196_v41  ;;  %v326_v57 = vand.u32 2147483647, %v1657_v50  ;;  %v329_v59 = vand.u32 2139095040, %v1657_v50  ;;  %v1676_v10 = vadd.f32 %v209_v1, %v196_v41 }
  0x59   : > { %v226_v58 = vshrl.u32 %v225_v56, 23  ;;  %v229_v60 = vand.u32 8388607, %v222_v53  ;;  %v433_v0 = vand.u32 2139095040, %v1664_v54  ;;  %v430_v15 = vand.u32 2147483647, %v1664_v54 }
  0x5a   : > { %v333_v61 = vand.u32 8388607, %v326_v57  ;;  %v330_v63 = vshrl.u32 %v329_v59, 23  ;;  %vm224_vm13 = vcmp.lt.s32.totalorder %v1653_v47, 0  ;;  %vm1784_vm15 = vcmp.le.f32.partialorder %v222_v53, 0.7853982 }
  0x5b   : > { %v1209_v62 = vadd.s32 4294967169, %v226_v58  ;;  %v434_v4 = vshrl.u32 %v433_v0, 23  ;;  %v230_v5 = vor.u32 8388608, %v229_v60 }
  0x5c   : > { %v1213_v3 = vadd.s32 4294967169, %v330_v63  ;;  %v334_v6 = vor.u32 8388608, %v333_v61 }
  0x5d   : > { %v232_v2 = vadd.s32 1, %v1209_v62  ;;  %v1217_v8 = vadd.s32 4294967169, %v434_v4  ;;  %v1678_v13 = vshll.u32 %v230_v5, 8 }
  0x5e   : > { %v336_v7 = vadd.s32 1, %v1213_v3  ;;  %v1680_v14 = vshll.u32 %v334_v6, 8 }
  0x5f   : > { %vm233_vm0 = vcmp.gt.s32.totalorder %v232_v2, 0  ;;  %v1683_v16 = vadd.s32 1, %v1217_v8 }
  0x60   : > { %v234_v9 = vsel %vm233_vm0, %v232_v2, 0  ;;  %vm337_vm1 = vcmp.gt.s32.totalorder %v336_v7, 0 }
  0x61   : > { %v235_v11 = vshrl.u32 %v234_v9, 5  ;;  %v236_v12 = vand.u32 31, %v234_v9  ;;  %v338_v28 = vsel %vm337_vm1, %v336_v7, 0  ;;  %vm441_vm8 = vcmp.gt.s32.totalorder %v1683_v16, 0 }
  0x62   : > { %v339_v41 = vshrl.u32 %v338_v28, 5  ;;  %v340_v42 = vand.u32 31, %v338_v28 }
  0x63   : > { %v237_v17 = vsub.s32 32, %v236_v12  ;;  %v239_v19 = vshll.u32 %v1509_v18, %v236_v12  ;;  %v242_v21 = vshll.u32 %v1510_v20, %v236_v12  ;;  %v245_v23 = vshll.u32 %v1511_v22, %v236_v12 }
  0x64   : > { %v248_v25 = vshll.u32 %v1512_v24, %v236_v12  ;;  %v251_v27 = vshll.u32 %v1513_v26, %v236_v12  ;;  %vm254_vm2 = vcmp.lt.s32.totalorder %v235_v11, 1  ;;  %vm255_vm3 = vcmp.lt.s32.totalorder %v235_v11, 2 }
  0x65   : > { %v238_v29 = vshrl.u32 %v1509_v18, %v237_v17  ;;  %v240_v30 = vshrl.u32 %v1510_v20, %v237_v17  ;;  %v243_v31 = vshrl.u32 %v1511_v22, %v237_v17  ;;  %v246_v32 = vshrl.u32 %v1512_v24, %v237_v17 }
  0x66   : > { %v249_v33 = vshrl.u32 %v1513_v26, %v237_v17  ;;  %v252_v35 = vshrl.u32 %v1514_v34, %v237_v17  ;;  %vm256_vm4 = vcmp.lt.s32.totalorder %v235_v11, 3  ;;  %vm257_vm5 = vcmp.lt.s32.totalorder %v235_v11, 4 }
  0x67   : > { %v241_v36 = vor.u32 %v240_v30, %v239_v19  ;;  %v244_v37 = vor.u32 %v243_v31, %v242_v21  ;;  %v247_v38 = vor.u32 %v246_v32, %v245_v23  ;;  %v341_v59 = vsub.s32 32, %v340_v42 }
  0x68   : > { %v250_v39 = vor.u32 %v249_v33, %v248_v25  ;;  %v253_v40 = vor.u32 %v252_v35, %v251_v27  ;;  %v343_v63 = vshll.u32 %v1509_v18, %v340_v42  ;;  %v346_v9 = vshll.u32 %v1510_v20, %v340_v42 }
  0x69   : > { %v258_v43 = vsel %vm254_vm2, %v238_v29, %v241_v36  ;;  %v259_v44 = vsel %vm257_vm5, %v247_v38, 2102212464  ;;  %v262_v45 = vsel %vm254_vm2, %v241_v36, %v244_v37  ;;  %v266_v46 = vsel %vm254_vm2, %v244_v37, %v247_v38 }
  0x6a   : > { %v260_v49 = vsel %vm256_vm4, %v244_v37, %v259_v44  ;;  %v263_v56 = vsel %vm257_vm5, %v250_v39, 920167782  ;;  %v267_v58 = vsel %vm257_vm5, %v253_v40, 1326507024  ;;  %v342_v3 = vshrl.u32 %v1509_v18, %v341_v59 }
  0x6b   : > { %v261_v60 = vsel %vm255_vm3, %v258_v43, %v260_v49  ;;  %v264_v61 = vsel %vm256_vm4, %v247_v38, %v263_v56  ;;  %v268_v62 = vsel %vm256_vm4, %v250_v39, %v267_v58  ;;  %v344_v8 = vshrl.u32 %v1510_v20, %v341_v59 }
  0x6c   : > { %v265_v0 = vsel %vm255_vm3, %v262_v45, %v264_v61  ;;  %v269_v1 = vsel %vm255_vm3, %v266_v46, %v268_v62  ;;  %v277_v2 = vmul.u32 %v1678_v13, %v261_v60  ;;  %v347_v11 = vshrl.u32 %v1511_v22, %v341_v59 }
  0x6d   : > { %v1710_v4 = vmul.u32.u64.low %v1678_v13, %v269_v1  ;;  %v1711_v5 = vmul.u32.u64.high %v1678_v13, %v269_v1, %v1710_v4  ;;  %v1714_v6 = vmul.u32.u64.low %v1678_v13, %v265_v0  ;;  %v1715_v7 = vmul.u32.u64.high %v1678_v13, %v265_v0, %v1714_v6 }
  0x6e   : > { %v349_v12 = vshll.u32 %v1511_v22, %v340_v42  ;;  %v350_v17 = vshrl.u32 %v1512_v24, %v341_v59  ;;  %v352_v19 = vshll.u32 %v1512_v24, %v340_v42  ;;  %v353_v21 = vshrl.u32 %v1513_v26, %v341_v59 }
  0x6f   : > { %v355_v23 = vshll.u32 %v1513_v26, %v340_v42  ;;  %v345_v25 = vor.u32 %v344_v8, %v343_v63  ;;  %v348_v13 = vor.u32 %v347_v11, %v346_v9  ;;  %v356_v27 = vshrl.u32 %v1514_v34, %v341_v59 }
  0x70   : > { %vm358_vm6 = vcmp.lt.s32.totalorder %v339_v41, 1  ;;  %vm279_vm7 = vc.u32 %v1711_v5, %v1714_v6  ;;  %v280_v28 = vadd.s32 1, %v1715_v7  ;;  %v351_v29 = vor.u32 %v350_v17, %v349_v12 }
  0x71   : > { %v354_v30 = vor.u32 %v353_v21, %v352_v19  ;;  %v357_v31 = vor.u32 %v356_v27, %v355_v23  ;;  %vm359_vm9 = vcmp.lt.s32.totalorder %v339_v41, 2  ;;  %vm360_vm10 = vcmp.lt.s32.totalorder %v339_v41, 3 }
  0x72   : > { %v281_v32 = vsel %vm279_vm7, %v280_v28, %v1715_v7  ;;  %vm361_vm11 = vcmp.lt.s32.totalorder %v339_v41, 4  ;;  %v362_v33 = vsel %vm358_vm6, %v342_v3, %v345_v25  ;;  %v366_v35 = vsel %vm358_vm6, %v345_v25, %v348_v13 }
  0x73   : > { %v282_v36 = vadd.s32 %v281_v32, %v277_v2  ;;  %v363_v37 = vsel %vm361_vm11, %v351_v29, 2102212464  ;;  %v367_v38 = vsel %vm361_vm11, %v354_v30, 920167782  ;;  %v370_v39 = vsel %vm358_vm6, %v348_v13, %v351_v29 }
  0x74   : > { %v364_v40 = vsel %vm360_vm10, %v348_v13, %v363_v37  ;;  %v368_v42 = vsel %vm360_vm10, %v351_v29, %v367_v38  ;;  %v371_v43 = vsel %vm361_vm11, %v357_v31, 1326507024  ;;  %v437_v44 = vand.u32 8388607, %v430_v15 }
  0x75   : > { %v283_v45 = vadd.s32 536870912, %v282_v36  ;;  %v369_v46 = vsel %vm359_vm9, %v366_v35, %v368_v42  ;;  %v372_v49 = vsel %vm360_vm10, %v354_v30, %v371_v43  ;;  %v442_v56 = vsel %vm441_vm8, %v1683_v16, 0 }
  0x76   : > { %v365_v58 = vsel %vm359_vm9, %v362_v33, %v364_v40  ;;  %v373_v59 = vsel %vm359_vm9, %v370_v39, %v372_v49  ;;  %v1744_v60 = vmul.u32.u64.low %v1680_v14, %v369_v46  ;;  %v1745_v61 = vmul.u32.u64.high %v1680_v14, %v369_v46, %v1744_v60 }
  0x77   : > { %v284_v62 = vshrl.u32 %v283_v45, 30  ;;  %v1749_v63 = vmul.u32.u64.low %v1680_v14, %v373_v59  ;;  %v1750_v0 = vmul.u32.u64.high %v1680_v14, %v373_v59, %v1749_v63  ;;  %v537_v1 = vand.u32 2139095040, %v1676_v10 }
  0x78   : > { %v438_v2 = vor.u32 8388608, %v437_v44  ;;  %v444_v3 = vand.u32 31, %v442_v56  ;;  %v381_v16 = vmul.u32 %v1680_v14, %v365_v58  ;;  %v384_v41 = vadd.s32 1, %v1745_v61 }
  0x79   : > { %v285_v4 = vshll.u32 %v284_v62, 30  ;;  %vm383_vm12 = vc.u32 %v1750_v0, %v1744_v60  ;;  %v534_v9 = vand.u32 2147483647, %v1676_v10  ;;  %v538_v11 = vshrl.u32 %v537_v1, 23 }
  0x7a   : > { %v445_v7 = vsub.s32 32, %v444_v3  ;;  %v385_v12 = vsel %vm383_vm12, %v384_v41, %v1745_v61  ;;  %v447_v17 = vshll.u32 %v1509_v18, %v444_v3  ;;  %v450_v19 = vshll.u32 %v1510_v20, %v444_v3 }
  0x7b   : > { %v1755_v8 = vsub.s32 %v282_v36, %v285_v4  ;;  %v1764_v14 = vshll.u32 %v438_v2, 8  ;;  %v386_v23 = vadd.s32 %v385_v12, %v381_v16  ;;  %v443_v27 = vshrl.u32 %v442_v56, 5 }
  0x7c   : > { %v448_v25 = vshrl.u32 %v1510_v20, %v445_v7  ;;  %v451_v13 = vshrl.u32 %v1511_v22, %v445_v7  ;;  %v453_v28 = vshll.u32 %v1511_v22, %v444_v3  ;;  %v454_v29 = vshrl.u32 %v1512_v24, %v445_v7 }
  0x7d   : > { %v288_v21 = vsub.s32 0, %v1755_v8  ;;  %v456_v30 = vshll.u32 %v1512_v24, %v444_v3  ;;  %v387_v32 = vadd.s32 536870912, %v386_v23  ;;  %v1221_v33 = vadd.s32 4294967169, %v538_v11 }
  0x7e   : > { %v1775_v35 = vand.u32 8388607, %v534_v9  ;;  %v278_v36 = vadd.s32 %v1714_v6, %v1711_v5  ;;  %v457_v37 = vshrl.u32 %v1513_v26, %v445_v7  ;;  %v459_v38 = vshll.u32 %v1513_v26, %v444_v3 }
  0x7f   : > { %v1210_v31 = vmin.u32 %v288_v21, %v1755_v8  ;;  %v460_v39 = vshrl.u32 %v1514_v34, %v445_v7  ;;  %v308_v42 = vsub.s32 4, %v284_v62  ;;  %v449_v43 = vor.u32 %v448_v25, %v447_v17 }
  0x80   : > { %v452_v44 = vor.u32 %v451_v13, %v450_v19  ;;  %v388_v45 = vshrl.u32 %v387_v32, 30  ;;  %v455_v46 = vor.u32 %v454_v29, %v453_v28  ;;  %v458_v49 = vor.u32 %v457_v37, %v456_v30 }
  0x81   : > { %v290_v40 = vclz %v1210_v31  ;;  %vm462_vm14 = vcmp.lt.s32.totalorder %v443_v27, 1  ;;  %vm464_vm0 = vcmp.lt.s32.totalorder %v443_v27, 3  ;;  %vm465_vm1 = vcmp.lt.s32.totalorder %v443_v27, 4 }
  0x82   : > { %v544_v6 = vadd.s32 1, %v1221_v33  ;;  %v389_v58 = vshll.u32 %v388_v45, 30  ;;  %v446_v59 = vshrl.u32 %v1509_v18, %v445_v7  ;;  %v461_v61 = vor.u32 %v460_v39, %v459_v38 }
  0x83   : > { %v1211_v5 = vadd.s32 4294967294, %v290_v40  ;;  %v471_v63 = vsel %vm465_vm1, %v458_v49, 920167782  ;;  %v309_v1 = vsel %vm224_vm13, %v308_v42, %v284_v62  ;;  %vm463_vm3 = vcmp.lt.s32.totalorder %v443_v27, 2 }
  0x84   : > { %v470_v53 = vsel %vm462_vm14, %v449_v43, %v452_v44  ;;  %v1793_v3 = vsub.s32 %v386_v23, %v389_v58  ;;  %v467_v4 = vsel %vm465_vm1, %v455_v46, 2102212464  ;;  %v472_v16 = vsel %vm464_vm0, %v455_v46, %v471_v63 }
  0x85   : > { %vm1212_vm2 = vcmp.lt.s32.totalorder %v1211_v5, 0  ;;  %v474_v12 = vsel %vm462_vm14, %v452_v44, %v455_v46  ;;  %v412_v19 = vsub.s32 4, %v388_v45  ;;  %v466_v62 = vsel %vm462_vm14, %v446_v59, %v449_v43 }
  0x86   : > { %v293_v2 = vsel %vm1212_vm2, 0, %v1211_v5  ;;  %v392_v17 = vsub.s32 0, %v1793_v3  ;;  %v475_v21 = vsel %vm465_vm1, %v461_v61, 1326507024  ;;  %v468_v13 = vsel %vm464_vm0, %v452_v44, %v467_v4 }
  0x87   : > { %v294_v41 = vsub.s32 32, %v293_v2  ;;  %v295_v7 = vshll.u32 %v1755_v8, %v293_v2  ;;  %v298_v11 = vsub.s32 4294967266, %v293_v2  ;;  %v476_v28 = vsel %vm464_vm0, %v458_v49, %v475_v21 }
  0x88   : > { %v1214_v29 = vmin.u32 %v392_v17, %v1793_v3  ;;  %v473_v8 = vsel %vm463_vm3, %v470_v53, %v472_v16  ;;  %v477_v30 = vsel %vm463_vm3, %v474_v12, %v476_v28  ;;  %vm545_vm4 = vcmp.gt.s32.totalorder %v544_v6, 0 }
  0x89   : > { %v296_v25 = vshrl.u32 %v278_v36, %v294_v41  ;;  %v299_v23 = vadd.s32 127, %v298_v11  ;;  %v1808_v33 = vmul.u32.u64.low %v1764_v14, %v477_v30  ;;  %v1809_v37 = vmul.u32.u64.high %v1764_v14, %v477_v30, %v1808_v33 }
  0x8a   : > { %v311_v36 = vsel %vm1784_vm15, 0, %v309_v1  ;;  %v394_v38 = vclz %v1214_v29  ;;  %v469_v39 = vsel %vm463_vm3, %v466_v62, %v468_v13  ;;  %v542_v40 = vor.u32 8388608, %v1775_v35 }
  0x8b   : > { %v297_v31 = vor.u32 %v296_v25, %v295_v7  ;;  %v300_v32 = vshll.u32 %v299_v23, 23  ;;  %v1816_v44 = vmul.u32.u64.low %v1764_v14, %v473_v8  ;;  %v1817_v46 = vmul.u32.u64.high %v1764_v14, %v473_v8, %v1816_v44 }
  0x8c   : > { %vm1822_vm5 = vcmp.le.f32.partialorder %v326_v57, 0.7853982  ;;  %vm328_vm6 = vcmp.lt.s32.totalorder %v1657_v50, 0  ;;  %v1215_v5 = vadd.s32 4294967294, %v394_v38  ;;  %v546_v27 = vsel %vm545_vm4, %v544_v6, 0 }
  0x8d   : > { %v301_v42 = vor.u32 4788187, %v300_v32  ;;  %v304_v43 = vcvt.s32.f32 %v297_v31  ;;  %v315_v59 = vadd.s32 3, %v311_v36  ;;  %v382_v35 = vadd.s32 %v1744_v60, %v1750_v0 }
  0x8e   : > { %v413_v61 = vsel %vm328_vm6, %v412_v19, %v388_v45  ;;  %vm1216_vm7 = vcmp.lt.s32.totalorder %v1215_v5, 0  ;;  %v485_v63 = vmul.u32 %v1764_v14, %v469_v39  ;;  %vm487_vm8 = vc.u32 %v1809_v37, %v1816_v44 }
  0x8f   : > { %v302_v58 = vand.u32 2147483647, %v301_v42  ;;  %v548_v57 = vand.u32 31, %v546_v27  ;;  %v397_v53 = vsel %vm1216_vm7, 0, %v1215_v5  ;;  %v488_v2 = vadd.s32 1, %v1817_v46 }
  0x90   : > { %v1835_v6 = vshll.u32 %v542_v40, 8  ;;  %v398_v4 = vsub.s32 32, %v397_v53  ;;  %v399_v16 = vshll.u32 %v1793_v3, %v397_v53  ;;  %v402_v60 = vsub.s32 4294967266, %v397_v53 }
  0x91   : > { %v305_v1 = vmul.f32 %v304_v43, %v302_v58  ;;  %v549_v0 = vsub.s32 32, %v548_v57  ;;  %v1838_v45 = vand.u32 3, %v315_v59  ;;  %v415_v14 = vsel %vm1822_vm5, 0, %v413_v61 }
  0x92   : > { %v489_v7 = vsel %vm487_vm8, %v488_v2, %v1817_v46  ;;  %v400_v11 = vshrl.u32 %v382_v35, %v398_v4  ;;  %v403_v12 = vadd.s32 127, %v402_v60  ;;  %v1843_v19 = vshrl.u32 %v546_v27, 5 }
  0x93   : > { %v306_v41 = vxor.u32 2147483648, %v305_v1  ;;  %v490_v17 = vadd.s32 %v489_v7, %v485_v63  ;;  %v551_v3 = vshll.u32 %v1509_v18, %v548_v57  ;;  %v552_v21 = vshrl.u32 %v1510_v20, %v549_v0 }
  0x94   : > { %v554_v25 = vshll.u32 %v1510_v20, %v548_v57  ;;  %v401_v13 = vor.u32 %v400_v11, %v399_v16  ;;  %v404_v28 = vshll.u32 %v403_v12, 23  ;;  %v555_v8 = vshrl.u32 %v1511_v22, %v549_v0 }
  0x95   : > { %v307_v62 = vsel %vm224_vm13, %v306_v41, %v305_v1  ;;  %v491_v29 = vadd.s32 536870912, %v490_v17  ;;  %v557_v30 = vshll.u32 %v1511_v22, %v548_v57  ;;  %v558_v31 = vshrl.u32 %v1512_v24, %v549_v0 }
  0x96   : > { %v310_v23 = vsel %vm1784_vm15, %v1653_v47, %v307_v62  ;;  %v405_v32 = vor.u32 4788187, %v404_v28  ;;  %v408_v33 = vcvt.s32.f32 %v401_v13  ;;  %vm321_vm9 = vcmp.eq.s32.totalorder %v1838_v45, 2 }
  0x97   : > { %1360 = vcosq.f32 %v310_v23  ;;  %v492_v36 = vshrl.u32 %v491_v29, 30  ;;  %v560_v38 = vshll.u32 %v1512_v24, %v548_v57  ;;  %v561_v56 = vshrl.u32 %v1513_v26, %v549_v0 }
  0x98   : > { %1362 = vsinq.f32 %v310_v23  ;;  %v563_v39 = vshll.u32 %v1513_v26, %v548_v57  ;;  %vm318_vm10 = vcmp.eq.s32.totalorder %v1838_v45, 0  ;;  %v406_v40 = vand.u32 2147483647, %v405_v32 }
  0x99   : > { %v419_v42 = vadd.s32 3, %v415_v14  ;;  %vm432_vm11 = vcmp.lt.s32.totalorder %v1664_v54, 0  ;;  %v493_v43 = vshll.u32 %v492_v36, 30  ;;  %v564_v46 = vshrl.u32 %v1514_v34, %v549_v0 }
  0x9a   : > { %vm317_vm12 = vcmp.lt.s32.totalorder %v1838_v45, 2  ;;  %v553_v5 = vor.u32 %v552_v21, %v551_v3  ;;  %v556_v27 = vor.u32 %v555_v8, %v554_v25  ;;  %v559_v58 = vor.u32 %v558_v31, %v557_v30 }
  0x9b   : > { %v562_v59 = vor.u32 %v561_v56, %v560_v38  ;;  %vm314_vm13 = vweird.f32 %v1653_v47  ;;  %v409_v35 = vmul.f32 %v408_v33, %v406_v40  ;;  %v1865_v61 = vsub.s32 %v490_v17, %v493_v43 }
  0x9c   : > { %v565_v63 = vor.u32 %v564_v46, %v563_v39  ;;  %vm569_vm14 = vcmp.lt.s32.totalorder %v1843_v19, 4  ;;  %v550_v57 = vshrl.u32 %v1509_v18, %v549_v0  ;;  %vm566_vm15 = vcmp.lt.s32.totalorder %v1843_v19, 1 }
  0x9d   : > { %vm568_vm0 = vcmp.lt.s32.totalorder %v1843_v19, 3  ;;  %v641_v1 = vand.u32 2139095040, %v1655_v48  ;;  %v410_v53 = vxor.u32 2147483648, %v409_v35  ;;  %v496_v2 = vsub.s32 0, %v1865_v61 }
  0x9e   : > { %v516_v4 = vsub.s32 4, %v492_v36  ;;  %vm567_vm1 = vcmp.lt.s32.totalorder %v1843_v19, 2  ;;  %vm1876_vm2 = vcmp.le.f32.partialorder %v430_v15, 0.7853982  ;;  %v486_v60 = vadd.s32 %v1816_v44, %v1809_v37 }
  0x9f   : > { %v571_v0 = vsel %vm569_vm14, %v559_v58, 2102212464  ;;  %v575_v41 = vsel %vm569_vm14, %v562_v59, 920167782  ;;  %v579_v14 = vsel %vm569_vm14, %v565_v63, 1326507024  ;;  %v411_v7 = vsel %vm328_vm6, %v410_v53, %v409_v35 }
  0xa0   : > { %v1218_v11 = vmin.u32 %v496_v2, %v1865_v61  ;;  %v574_v12 = vsel %vm566_vm15, %v553_v5, %v556_v27  ;;  %v576_v15 = vsel %vm568_vm0, %v559_v58, %v575_v41  ;;  %v414_v62 = vsel %vm1822_vm5, %v1657_v50, %v411_v7 }
  0xa1   : > { %v1361_v17 = vpop.eup %1360  ;;  %v570_v37 = vsel %vm566_vm15, %v550_v57, %v553_v5  ;;  %v578_v44 = vsel %vm566_vm15, %v556_v27, %v559_v58  ;;  %v580_v3 = vsel %vm568_vm0, %v562_v59, %v579_v14  ;;  %1364 = vcosq.f32 %v414_v62 }
  0xa2   : > { %v1363_v21 = vpop.eup %1362  ;;  %v322_v25 = vxor.u32 2147483648, %v1361_v17  ;;  %v498_v23 = vclz %v1218_v11  ;;  %v572_v13 = vsel %vm568_vm0, %v556_v27, %v571_v0  ;;  %1366 = vsinq.f32 %v414_v62 }
  0xa3   : > { %v319_v28 = vxor.u32 2147483648, %v1363_v21  ;;  %v517_v49 = vsel %vm432_vm11, %v516_v4, %v492_v36  ;;  %v577_v29 = vsel %vm567_vm1, %v574_v12, %v576_v15  ;;  %v581_v31 = vsel %vm567_vm1, %v578_v44, %v580_v3 }
  0xa4   : > { %v323_v8 = vsel %vm321_vm9, %v322_v25, %v1363_v21  ;;  %v1219_v30 = vadd.s32 4294967294, %v498_v23  ;;  %v642_v32 = vshrl.u32 %v641_v1, 23  ;;  %v573_v38 = vsel %vm567_vm1, %v570_v37, %v572_v13 }
  0xa5   : > { %v320_v33 = vsel %vm318_vm10, %v1361_v17, %v319_v28  ;;  %v1913_v56 = vmul.u32.u64.low %v1835_v6, %v581_v31  ;;  %v1914_v36 = vmul.u32.u64.high %v1835_v6, %v581_v31, %v1913_v56  ;;  %v420_v5 = vand.u32 3, %v419_v42 }
  0xa6   : > { %v324_v39 = vsel %vm317_vm12, %v320_v33, %v323_v8  ;;  %vm1220_vm3 = vcmp.lt.s32.totalorder %v1219_v30, 0  ;;  %v1919_v40 = vmul.u32.u64.low %v1835_v6, %v577_v29  ;;  %v1920_v43 = vmul.u32.u64.high %v1835_v6, %v577_v29, %v1919_v40 }
  0xa7   : > { %v325_v46 = vsel %vm314_vm13, nan, %v324_v39  ;;  %v501_v27 = vsel %vm1220_vm3, 0, %v1219_v30  ;;  %v1225_v19 = vadd.s32 4294967169, %v642_v32  ;;  %v519_v45 = vsel %vm1876_vm2, 0, %v517_v49 }
  0xa8   : > { %v502_v58 = vsub.s32 32, %v501_v27  ;;  %v503_v59 = vshll.u32 %v1865_v61, %v501_v27  ;;  %v506_v35 = vsub.s32 4294967266, %v501_v27  ;;  %1054 = vst [vmem:[#allocation2] sm:$0xff] %v325_v46  ;;  %v589_v63 = vmul.u32 %v1835_v6, %v573_v38 }
  0xa9   : > { %vm591_vm4 = vc.u32 %v1914_v36, %v1919_v40  ;;  %v648_v57 = vadd.s32 1, %v1225_v19  ;;  %vm418_vm5 = vweird.f32 %v1657_v50  ;;  %v592_v1 = vadd.s32 1, %v1920_v43 }
  0xaa   : > { %v504_v47 = vshrl.u32 %v486_v60, %v502_v58  ;;  %v507_v42 = vadd.s32 127, %v506_v35  ;;  %vm425_vm6 = vcmp.eq.s32.totalorder %v420_v5, 2  ;;  %v523_v53 = vadd.s32 3, %v519_v45 }
  0xab   : > { %v638_v61 = vand.u32 2147483647, %v1655_v48  ;;  %vm649_vm7 = vcmp.gt.s32.totalorder %v648_v57, 0  ;;  %v1365_v2 = vpop.eup %1364  ;;  %v593_v6 = vsel %vm591_vm4, %v592_v1, %v1920_v43  ;;  %vm422_vm8 = vcmp.eq.s32.totalorder %v420_v5, 0 }
  0xac   : > { %v505_v4 = vor.u32 %v504_v47, %v503_v59  ;;  %v508_v0 = vshll.u32 %v507_v42, 23  ;;  %v650_v41 = vsel %vm649_vm7, %v648_v57, 0  ;;  %v1367_v14 = vpop.eup %1366  ;;  %v426_v7 = vxor.u32 2147483648, %v1365_v2 }
  0xad   : > { %v594_v11 = vadd.s32 %v593_v6, %v589_v63  ;;  %v652_v12 = vand.u32 31, %v650_v41  ;;  %vm421_vm9 = vcmp.lt.s32.totalorder %v420_v5, 2  ;;  %v423_v60 = vxor.u32 2147483648, %v1367_v14 }
  0xae   : > { %v509_v15 = vor.u32 4788187, %v508_v0  ;;  %v512_v17 = vcvt.s32.f32 %v505_v4  ;;  %v427_v62 = vsel %vm425_vm6, %v426_v7, %v1367_v14  ;;  %v645_v44 = vand.u32 8388607, %v638_v61 }
  0xaf   : > { %v595_v37 = vadd.s32 536870912, %v594_v11  ;;  %v653_v3 = vsub.s32 32, %v652_v12  ;;  %v424_v21 = vsel %vm422_vm8, %v1365_v2, %v423_v60  ;;  %v1938_v23 = vand.u32 3, %v523_v53 }
  0xb0   : > { %v510_v25 = vand.u32 2147483647, %v509_v15  ;;  %v651_v13 = vshrl.u32 %v650_v41, 5  ;;  %v428_v28 = vsel %vm421_vm9, %v424_v21, %v427_v62  ;;  %v655_v29 = vshll.u32 %v1509_v18, %v652_v12 }
  0xb1   : > { %v1940_v49 = vshrl.u32 %v595_v37, 30  ;;  %v658_v8 = vshll.u32 %v1510_v20, %v652_v12  ;;  %v429_v30 = vsel %vm418_vm5, nan, %v428_v28  ;;  %v656_v32 = vshrl.u32 %v1510_v20, %v653_v3 }
  0xb2   : > { %v513_v31 = vmul.f32 %v512_v17, %v510_v25  ;;  %v659_v33 = vshrl.u32 %v1511_v22, %v653_v3  ;;  %v661_v56 = vshll.u32 %v1511_v22, %v652_v12  ;;  %v662_v39 = vshrl.u32 %v1512_v24, %v653_v3  ;;  %1055 = vst [vmem:[#allocation2 + $0x8] sm:$0xff] %v429_v30 }
  0xb3   : > { %v597_v38 = vshll.u32 %v1940_v49, 30  ;;  %v664_v43 = vshll.u32 %v1512_v24, %v652_v12  ;;  %v646_v5 = vor.u32 8388608, %v645_v44  ;;  %v665_v27 = vshrl.u32 %v1513_v26, %v653_v3 }
  0xb4   : > { %v514_v46 = vxor.u32 2147483648, %v513_v31  ;;  %v745_v50 = vand.u32 2139095040, %v1659_v51  ;;  %v654_v58 = vshrl.u32 %v1509_v18, %v653_v3  ;;  %v667_v59 = vshll.u32 %v1513_v26, %v652_v12 }
  0xb5   : > { %v1954_v19 = vsub.s32 %v594_v11, %v597_v38  ;;  %v668_v35 = vshrl.u32 %v1514_v34, %v653_v3  ;;  %v657_v63 = vor.u32 %v656_v32, %v655_v29  ;;  %v660_v57 = vor.u32 %v659_v33, %v658_v8 }
  0xb6   : > { %v515_v45 = vsel %vm432_vm11, %v514_v46, %v513_v31  ;;  %v666_v47 = vor.u32 %v665_v27, %v664_v43  ;;  %v663_v53 = vor.u32 %v662_v39, %v661_v56  ;;  %vm670_vm10 = vcmp.lt.s32.totalorder %v651_v13, 1 }
  0xb7   : > { %v518_v42 = vsel %vm1876_vm2, %v1664_v54, %v515_v45  ;;  %v600_v1 = vsub.s32 0, %v1954_v19  ;;  %v669_v2 = vor.u32 %v668_v35, %v667_v59  ;;  %vm673_vm12 = vcmp.lt.s32.totalorder %v651_v13, 4 }
  0xb8   : > { %1368 = vcosq.f32 %v518_v42  ;;  %v746_v4 = vshrl.u32 %v745_v50, 23  ;;  %vm672_vm13 = vcmp.lt.s32.totalorder %v651_v13, 3  ;;  %v686_v6 = vshll.u32 %v646_v5, 8 }
  0xb9   : > { %1370 = vsinq.f32 %v518_v42  ;;  %v1222_v0 = vmin.u32 %v600_v1, %v1954_v19  ;;  %vm536_vm11 = vcmp.lt.s32.totalorder %v1676_v10, 0  ;;  %vm671_vm14 = vcmp.lt.s32.totalorder %v651_v13, 2 }
  0xba   : > { %v675_v41 = vsel %vm673_vm12, %v663_v53, 2102212464  ;;  %v678_v16 = vsel %vm670_vm10, %v657_v63, %v660_v57  ;;  %v679_v14 = vsel %vm673_vm12, %v666_v47, 920167782  ;;  %v590_v7 = vadd.s32 %v1919_v40, %v1914_v36 }
  0xbb   : > { %v602_v11 = vclz %v1222_v0  ;;  %v674_v12 = vsel %vm670_vm10, %v654_v58, %v657_v63  ;;  %v682_v60 = vsel %vm670_vm10, %v660_v57, %v663_v53  ;;  %v676_v15 = vsel %vm672_vm13, %v660_v57, %v675_v41 }
  0xbc   : > { %v680_v17 = vsel %vm672_vm13, %v663_v53, %v679_v14  ;;  %v683_v62 = vsel %vm673_vm12, %v669_v2, 1326507024  ;;  %v1229_v37 = vadd.s32 4294967169, %v746_v4  ;;  %vm522_vm15 = vweird.f32 %v1664_v54 }
  0xbd   : > { %v1223_v44 = vadd.s32 4294967294, %v602_v11  ;;  %v681_v3 = vsel %vm671_vm14, %v678_v16, %v680_v17  ;;  %v684_v21 = vsel %vm672_vm13, %v666_v47, %v683_v62  ;;  %v742_v36 = vand.u32 2147483647, %v1659_v51 }
  0xbe   : > { %v620_v40 = vsub.s32 4, %v1940_v49  ;;  %v685_v25 = vsel %vm671_vm14, %v682_v60, %v684_v21  ;;  %v1983_v28 = vmul.u32.u64.low %v686_v6, %v681_v3  ;;  %v1984_v29 = vmul.u32.u64.high %v686_v6, %v681_v3, %v1983_v28 }
  0xbf   : > { %vm1224_vm0 = vcmp.lt.s32.totalorder %v1223_v44, 0  ;;  %v677_v8 = vsel %vm671_vm14, %v674_v12, %v676_v15  ;;  %v1988_v30 = vmul.u32.u64.low %v686_v6, %v685_v25  ;;  %v1989_v31 = vmul.u32.u64.high %v686_v6, %v685_v25, %v1988_v30 }
  0xc0   : > { %vm526_vm1 = vcmp.eq.s32.totalorder %v1938_v23, 0  ;;  %vm1994_vm2 = vcmp.le.f32.partialorder %v534_v9, 0.7853982  ;;  %v605_v33 = vsel %vm1224_vm0, 0, %v1223_v44  ;;  %v752_v38 = vadd.s32 1, %v1229_v37 }
  0xc1   : > { %vm529_vm3 = vcmp.eq.s32.totalorder %v1938_v23, 2  ;;  %v606_v56 = vsub.s32 32, %v605_v33  ;;  %v607_v39 = vshll.u32 %v1954_v19, %v605_v33  ;;  %v610_v13 = vsub.s32 4294967266, %v605_v33 }
  0xc2   : > { %v1369_v43 = vpop.eup %1368  ;;  %v693_v46 = vmul.u32 %v686_v6, %v677_v8  ;;  %v696_v5 = vadd.s32 1, %v1984_v29  ;;  %v749_v27 = vand.u32 8388607, %v742_v36  ;;  %vm753_vm4 = vcmp.gt.s32.totalorder %v752_v38, 0 }
  0xc3   : > { %v1371_v9 = vpop.eup %1370  ;;  %v530_v50 = vxor.u32 2147483648, %v1369_v43  ;;  %v608_v58 = vshrl.u32 %v590_v7, %v606_v56  ;;  %v611_v59 = vadd.s32 127, %v610_v13  ;;  %v621_v35 = vsel %vm536_vm11, %v620_v40, %v1940_v49 }
  0xc4   : > { %vm525_vm5 = vcmp.lt.s32.totalorder %v1938_v23, 2  ;;  %v527_v19 = vxor.u32 2147483648, %v1371_v9  ;;  %vm695_vm6 = vc.u32 %v1989_v31, %v1983_v28  ;;  %v754_v45 = vsel %vm753_vm4, %v752_v38, 0 }
  0xc5   : > { %v531_v63 = vsel %vm529_vm3, %v530_v50, %v1371_v9  ;;  %v609_v57 = vor.u32 %v608_v58, %v607_v39  ;;  %v612_v47 = vshll.u32 %v611_v59, 23  ;;  %v697_v42 = vsel %vm695_vm6, %v696_v5, %v1984_v29 }
  0xc6   : > { %v528_v1 = vsel %vm526_vm1, %v1369_v43, %v527_v19  ;;  %v623_v49 = vsel %vm1994_vm2, 0, %v621_v35  ;;  %v698_v53 = vadd.s32 %v697_v42, %v693_v46  ;;  %v756_v2 = vand.u32 31, %v754_v45 }
  0xc7   : > { %v532_v4 = vsel %vm525_vm5, %v528_v1, %v531_v63  ;;  %v613_v0 = vor.u32 4788187, %v612_v47  ;;  %v616_v6 = vcvt.s32.f32 %v609_v57  ;;  %v750_v41 = vor.u32 8388608, %v749_v27 }
  0xc8   : > { %v533_v16 = vsel %vm522_vm15, nan, %v532_v4  ;;  %v699_v14 = vadd.s32 536870912, %v698_v53  ;;  %v755_v7 = vshrl.u32 %v754_v45, 5  ;;  %v757_v11 = vsub.s32 32, %v756_v2 }
  0xc9   : > { %v614_v12 = vand.u32 2147483647, %v613_v0  ;;  %v759_v60 = vshll.u32 %v1509_v18, %v756_v2  ;;  %v762_v23 = vshll.u32 %v1510_v20, %v756_v2  ;;  %v765_v15 = vshll.u32 %v1511_v22, %v756_v2  ;;  %1056 = vst [vmem:[#allocation2 + $0x10] sm:$0xff] %v533_v16 }
  0xca   : > { %v2021_v17 = vshrl.u32 %v699_v14, 30  ;;  %v760_v62 = vshrl.u32 %v1510_v20, %v757_v11  ;;  %v763_v37 = vshrl.u32 %v1511_v22, %v757_v11  ;;  %v768_v54 = vshll.u32 %v1512_v24, %v756_v2 }
  0xcb   : > { %v617_v44 = vmul.f32 %v616_v6, %v614_v12  ;;  %v766_v3 = vshrl.u32 %v1512_v24, %v757_v11  ;;  %v769_v21 = vshrl.u32 %v1513_v26, %v757_v11  ;;  %v771_v40 = vshll.u32 %v1513_v26, %v756_v2 }
  0xcc   : > { %v627_v25 = vadd.s32 3, %v623_v49  ;;  %v701_v29 = vshll.u32 %v2021_v17, 30  ;;  %v849_v8 = vand.u32 2139095040, %v1661_v52  ;;  %v758_v33 = vshrl.u32 %v1509_v18, %v757_v11 }
  0xcd   : > { %v618_v30 = vxor.u32 2147483648, %v617_v44  ;;  %v772_v38 = vshrl.u32 %v1514_v34, %v757_v11  ;;  %v2033_v56 = vshll.u32 %v750_v41, 8  ;;  %v761_v13 = vor.u32 %v760_v62, %v759_v60 }
  0xce   : > { %v2035_v39 = vsub.s32 %v698_v53, %v701_v29  ;;  %v764_v43 = vor.u32 %v763_v37, %v762_v23  ;;  %v767_v46 = vor.u32 %v766_v3, %v765_v15  ;;  %v770_v27 = vor.u32 %v769_v21, %v768_v54 }
  0xcf   : > { %v619_v5 = vsel %vm536_vm11, %v618_v30, %v617_v44  ;;  %v773_v9 = vor.u32 %v772_v38, %v771_v40  ;;  %vm774_vm7 = vcmp.lt.s32.totalorder %v755_v7, 1  ;;  %vm777_vm8 = vcmp.lt.s32.totalorder %v755_v7, 4 }
  0xd0   : > { %v622_v50 = vsel %vm1994_vm2, %v1676_v10, %v619_v5  ;;  %v704_v58 = vsub.s32 0, %v2035_v39  ;;  %v850_v59 = vshrl.u32 %v849_v8, 23  ;;  %vm775_vm9 = vcmp.lt.s32.totalorder %v755_v7, 2 }
  0xd1   : > { %1372 = vcosq.f32 %v622_v50  ;;  %vm776_vm10 = vcmp.lt.s32.totalorder %v755_v7, 3  ;;  %v779_v35 = vsel %vm777_vm8, %v767_v46, 2102212464  ;;  %v778_v45 = vsel %vm774_vm7, %v758_v33, %v761_v13 }
  0xd2   : > { %1374 = vsinq.f32 %v622_v50  ;;  %v1226_v19 = vmin.u32 %v704_v58, %v2035_v39  ;;  %v782_v63 = vsel %vm774_vm7, %v761_v13, %v764_v43  ;;  %v780_v57 = vsel %vm776_vm10, %v764_v43, %v779_v35 }
  0xd3   : > { %v783_v47 = vsel %vm777_vm8, %v770_v27, 920167782  ;;  %v786_v42 = vsel %vm774_vm7, %v764_v43, %v767_v46  ;;  %v787_v1 = vsel %vm777_vm8, %v773_v9, 1326507024  ;;  %v628_v49 = vand.u32 3, %v627_v25 }
  0xd4   : > { %v706_v32 = vclz %v1226_v19  ;;  %v784_v53 = vsel %vm776_vm10, %v767_v46, %v783_v47  ;;  %v788_v2 = vsel %vm776_vm10, %v770_v27, %v787_v1  ;;  %v846_v4 = vand.u32 2147483647, %v1661_v52 }
  0xd5   : > { %v1233_v0 = vadd.s32 4294967169, %v850_v59  ;;  %vm626_vm12 = vweird.f32 %v1676_v10  ;;  %v781_v41 = vsel %vm775_vm9, %v778_v45, %v780_v57  ;;  %v785_v16 = vsel %vm775_vm9, %v782_v63, %v784_v53 }
  0xd6   : > { %v1227_v6 = vadd.s32 4294967294, %v706_v32  ;;  %v789_v14 = vsel %vm775_vm9, %v786_v42, %v788_v2  ;;  %v2054_v60 = vmul.u32.u64.low %v2033_v56, %v785_v16  ;;  %v2055_v23 = vmul.u32.u64.high %v2033_v56, %v785_v16, %v2054_v60 }
  0xd7   : > { %v2050_v11 = vmul.u32.u64.low %v2033_v56, %v789_v14  ;;  %v2051_v12 = vmul.u32.u64.high %v2033_v56, %v789_v14, %v2050_v11  ;;  %vm640_vm13 = vcmp.lt.s32.totalorder %v1655_v48, 0  ;;  %v694_v15 = vadd.s32 %v1983_v28, %v1989_v31 }
  0xd8   : > { %vm1228_vm11 = vcmp.lt.s32.totalorder %v1227_v6, 0  ;;  %v856_v62 = vadd.s32 1, %v1233_v0  ;;  %vm633_vm14 = vcmp.eq.s32.totalorder %v628_v49, 2  ;;  %v724_v7 = vsub.s32 4, %v2021_v17 }
  0xd9   : > { %v709_v37 = vsel %vm1228_vm11, 0, %v1227_v6  ;;  %v797_v54 = vmul.u32 %v2033_v56, %v781_v41  ;;  %vm2066_vm0 = vcmp.le.f32.partialorder %v638_v61, 0.7853982  ;;  %vm799_vm1 = vc.u32 %v2051_v12, %v2054_v60 }
  0xda   : > { %v710_v44 = vsub.s32 32, %v709_v37  ;;  %v711_v3 = vshll.u32 %v2035_v39, %v709_v37  ;;  %v714_v21 = vsub.s32 4294967266, %v709_v37  ;;  %vm857_vm15 = vcmp.gt.s32.totalorder %v856_v62, 0 }
  0xdb   : > { %v1373_v40 = vpop.eup %1372  ;;  %v800_v28 = vadd.s32 1, %v2055_v23  ;;  %v853_v31 = vand.u32 8388607, %v846_v4  ;;  %v858_v29 = vsel %vm857_vm15, %v856_v62, 0  ;;  %vm630_vm2 = vcmp.eq.s32.totalorder %v628_v49, 0 }
  0xdc   : > { %v1375_v8 = vpop.eup %1374  ;;  %v634_v30 = vxor.u32 2147483648, %v1373_v40  ;;  %v712_v33 = vshrl.u32 %v694_v15, %v710_v44  ;;  %v715_v38 = vadd.s32 127, %v714_v21  ;;  %vm629_vm3 = vcmp.lt.s32.totalorder %v628_v49, 2 }
  0xdd   : > { %v631_v56 = vxor.u32 2147483648, %v1375_v8  ;;  %v801_v61 = vsel %vm799_vm1, %v800_v28, %v2055_v23  ;;  %v860_v39 = vand.u32 31, %v858_v29  ;;  %v725_v9 = vsel %vm640_vm13, %v724_v7, %v2021_v17 }
  0xde   : > { %v635_v13 = vsel %vm633_vm14, %v634_v30, %v1375_v8  ;;  %v713_v43 = vor.u32 %v712_v33, %v711_v3  ;;  %v716_v46 = vshll.u32 %v715_v38, 23  ;;  %v802_v5 = vadd.s32 %v801_v61, %v797_v54 }
  0xdf   : > { %v632_v27 = vsel %vm630_vm2, %v1373_v40, %v631_v56  ;;  %v854_v50 = vor.u32 8388608, %v853_v31  ;;  %v861_v58 = vsub.s32 32, %v860_v39  ;;  %v859_v57 = vshrl.u32 %v858_v29, 5 }
  0xe0   : > { %v636_v59 = vsel %vm629_vm3, %v632_v27, %v635_v13  ;;  %v717_v35 = vor.u32 4788187, %v716_v46  ;;  %v720_v19 = vcvt.s32.f32 %v713_v43  ;;  %v803_v45 = vadd.s32 536870912, %v802_v5 }
  0xe1   : > { %v637_v63 = vsel %vm626_vm12, nan, %v636_v59  ;;  %v863_v47 = vshll.u32 %v1509_v18, %v860_v39  ;;  %v866_v42 = vshll.u32 %v1510_v20, %v860_v39  ;;  %v864_v32 = vshrl.u32 %v1510_v20, %v861_v58 }
  0xe2   : > { %v718_v1 = vand.u32 2147483647, %v717_v35  ;;  %v2084_v49 = vshrl.u32 %v803_v45, 30  ;;  %v867_v17 = vshrl.u32 %v1511_v22, %v861_v58  ;;  %1057 = vst [vmem:[#allocation2 + $0x18] sm:$0xff] %v637_v63  ;;  %v869_v53 = vshll.u32 %v1511_v22, %v860_v39 }
  0xe3   : > { %v870_v2 = vshrl.u32 %v1512_v24, %v861_v58  ;;  %v872_v10 = vshll.u32 %v1512_v24, %v860_v39  ;;  %v873_v0 = vshrl.u32 %v1513_v26, %v861_v58  ;;  %v727_v41 = vsel %vm2066_vm0, 0, %v725_v9 }
  0xe4   : > { %v721_v6 = vmul.f32 %v720_v19, %v718_v1  ;;  %v805_v16 = vshll.u32 %v2084_v49, 30  ;;  %v2095_v14 = vshll.u32 %v854_v50, 8  ;;  %v862_v11 = vshrl.u32 %v1509_v18, %v861_v58 }
  0xe5   : > { %v874_v23 = vor.u32 %v873_v0, %v872_v10  ;;  %v875_v15 = vshll.u32 %v1513_v26, %v860_v39  ;;  %v876_v62 = vshrl.u32 %v1514_v34, %v861_v58  ;;  %v865_v54 = vor.u32 %v864_v32, %v863_v47 }
  0xe6   : > { %v722_v37 = vxor.u32 2147483648, %v721_v6  ;;  %v2100_v7 = vsub.s32 %v802_v5, %v805_v16  ;;  %v868_v44 = vor.u32 %v867_v17, %v866_v42  ;;  %v871_v3 = vor.u32 %v870_v2, %v869_v53 }
  0xe7   : > { %vm878_vm4 = vcmp.lt.s32.totalorder %v859_v57, 1  ;;  %vm879_vm5 = vcmp.lt.s32.totalorder %v859_v57, 2  ;;  %vm881_vm6 = vcmp.lt.s32.totalorder %v859_v57, 4  ;;  %v877_v28 = vor.u32 %v876_v62, %v875_v15 }
  0xe8   : > { %v723_v21 = vsel %vm640_vm13, %v722_v37, %v721_v6  ;;  %v808_v40 = vsub.s32 0, %v2100_v7  ;;  %vm880_vm7 = vcmp.lt.s32.totalorder %v859_v57, 3  ;;  %v882_v29 = vsel %vm878_vm4, %v862_v11, %v865_v54 }
  0xe9   : > { %v726_v31 = vsel %vm2066_vm0, %v1655_v48, %v723_v21  ;;  %v883_v8 = vsel %vm881_vm6, %v871_v3, 2102212464  ;;  %v887_v30 = vsel %vm881_vm6, %v874_v23, 920167782  ;;  %v886_v56 = vsel %vm878_vm4, %v865_v54, %v868_v44 }
  0xea   : > { %1376 = vcosq.f32 %v726_v31  ;;  %v1230_v33 = vmin.u32 %v808_v40, %v2100_v7  ;;  %v884_v38 = vsel %vm880_vm7, %v868_v44, %v883_v8  ;;  %v731_v61 = vadd.s32 3, %v727_v41 }
  0xeb   : > { %1378 = vsinq.f32 %v726_v31  ;;  %v888_v39 = vsel %vm880_vm7, %v871_v3, %v887_v30  ;;  %v953_v25 = vand.u32 2139095040, %v1666_v55  ;;  %v890_v43 = vsel %vm878_vm4, %v868_v44, %v871_v3 }
  0xec   : > { %v810_v13 = vclz %v1230_v33  ;;  %v885_v46 = vsel %vm879_vm5, %v882_v29, %v884_v38  ;;  %v889_v5 = vsel %vm879_vm5, %v886_v56, %v888_v39  ;;  %v891_v27 = vsel %vm881_vm6, %v877_v28, 1326507024 }
  0xed   : > { %v892_v50 = vsel %vm880_vm7, %v874_v23, %v891_v27  ;;  %v2122_v58 = vmul.u32.u64.low %v2095_v14, %v889_v5  ;;  %v2123_v59 = vmul.u32.u64.high %v2095_v14, %v889_v5, %v2122_v58  ;;  %v732_v35 = vand.u32 3, %v731_v61 }
  0xee   : > { %v1231_v9 = vadd.s32 4294967294, %v810_v13  ;;  %v893_v19 = vsel %vm879_vm5, %v890_v43, %v892_v50  ;;  %v954_v45 = vshrl.u32 %v953_v25, 23  ;;  %v798_v63 = vadd.s32 %v2054_v60, %v2051_v12 }
  0xef   : > { %v2130_v47 = vmul.u32.u64.low %v2095_v14, %v893_v19  ;;  %v2131_v42 = vmul.u32.u64.high %v2095_v14, %v893_v19, %v2130_v47  ;;  %vm730_vm9 = vweird.f32 %v1655_v48  ;;  %v901_v32 = vmul.u32 %v2095_v14, %v885_v46 }
  0xf0   : > { %vm1232_vm8 = vcmp.lt.s32.totalorder %v1231_v9, 0  ;;  %v1237_v17 = vadd.s32 4294967169, %v954_v45  ;;  %v904_v10 = vadd.s32 1, %v2123_v59  ;;  %vm733_vm10 = vcmp.lt.s32.totalorder %v732_v35, 2 }
  0xf1   : > { %v813_v1 = vsel %vm1232_vm8, 0, %v1231_v9  ;;  %vm744_vm12 = vcmp.lt.s32.totalorder %v1659_v51, 0  ;;  %v828_v12 = vsub.s32 4, %v2084_v49  ;;  %vm737_vm13 = vcmp.eq.s32.totalorder %v732_v35, 2 }
  0xf2   : > { %v814_v53 = vsub.s32 32, %v813_v1  ;;  %v815_v2 = vshll.u32 %v2100_v7, %v813_v1  ;;  %v818_v57 = vsub.s32 4294967266, %v813_v1  ;;  %v960_v60 = vadd.s32 1, %v1237_v17 }
  0xf3   : > { %vm903_vm11 = vc.u32 %v2131_v42, %v2122_v58  ;;  %vm734_vm14 = vcmp.eq.s32.totalorder %v732_v35, 0  ;;  %v829_v54 = vsel %vm744_vm12, %v828_v12, %v2084_v49  ;;  %v950_v44 = vand.u32 2147483647, %v1666_v55 }
  0xf4   : > { %v1377_v0 = vpop.eup %1376  ;;  %v816_v6 = vshrl.u32 %v798_v63, %v814_v53  ;;  %v819_v41 = vadd.s32 127, %v818_v57  ;;  %v905_v11 = vsel %vm903_vm11, %v904_v10, %v2123_v59  ;;  %vm961_vm15 = vcmp.gt.s32.totalorder %v960_v60, 0 }
  0xf5   : > { %v1379_v16 = vpop.eup %1378  ;;  %v738_v14 = vxor.u32 2147483648, %v1377_v0  ;;  %v906_v37 = vadd.s32 %v905_v11, %v901_v32  ;;  %v962_v3 = vsel %vm961_vm15, %v960_v60, 0  ;;  %vm2151_vm0 = vcmp.le.f32.partialorder %v742_v36, 0.7853982 }
  0xf6   : > { %v735_v23 = vxor.u32 2147483648, %v1379_v16  ;;  %v817_v15 = vor.u32 %v816_v6, %v815_v2  ;;  %v820_v62 = vshll.u32 %v819_v41, 23  ;;  %v964_v8 = vand.u32 31, %v962_v3 }
  0xf7   : > { %v739_v7 = vsel %vm737_vm13, %v738_v14, %v1379_v16  ;;  %v907_v31 = vadd.s32 536870912, %v906_v37  ;;  %v831_v56 = vsel %vm2151_vm0, 0, %v829_v54  ;;  %v957_v61 = vand.u32 8388607, %v950_v44 }
  0xf8   : > { %v736_v21 = vsel %vm734_vm14, %v1377_v0, %v735_v23  ;;  %v821_v40 = vor.u32 4788187, %v820_v62  ;;  %v824_v28 = vcvt.s32.f32 %v817_v15  ;;  %v963_v39 = vshrl.u32 %v962_v3, 5 }
  0xf9   : > { %v740_v29 = vsel %vm733_vm10, %v736_v21, %v739_v7  ;;  %v2155_v38 = vshrl.u32 %v907_v31, 30  ;;  %v965_v25 = vsub.s32 32, %v964_v8  ;;  %v967_v36 = vshll.u32 %v1509_v18, %v964_v8 }
  0xfa   : > { %v741_v30 = vsel %vm730_vm9, nan, %v740_v29  ;;  %v822_v49 = vand.u32 2147483647, %v821_v40  ;;  %v970_v43 = vshll.u32 %v1510_v20, %v964_v8  ;;  %v973_v27 = vshll.u32 %v1511_v22, %v964_v8 }
  0xfb   : > { %1058 = vst [vmem:[#allocation2 + $0x20] sm:$0xff] %v741_v30  ;;  %v909_v13 = vshll.u32 %v2155_v38, 30  ;;  %v968_v46 = vshrl.u32 %v1510_v20, %v965_v25  ;;  %v971_v5 = vshrl.u32 %v1511_v22, %v965_v25  ;;  %v976_v9 = vshll.u32 %v1512_v24, %v964_v8 }
  0xfc   : > { %v825_v48 = vmul.f32 %v824_v28, %v822_v49  ;;  %v974_v35 = vshrl.u32 %v1512_v24, %v965_v25  ;;  %v977_v19 = vshrl.u32 %v1513_v26, %v965_v25  ;;  %v835_v45 = vadd.s32 3, %v831_v56 }
  0xfd   : > { %v910_v59 = vsub.s32 %v906_v37, %v909_v13  ;;  %v958_v63 = vor.u32 8388608, %v957_v61  ;;  %v966_v47 = vshrl.u32 %v1509_v18, %v965_v25  ;;  %v969_v32 = vor.u32 %v968_v46, %v967_v36 }
  0xfe   : > { %v826_v50 = vxor.u32 2147483648, %v825_v48  ;;  %v972_v17 = vor.u32 %v971_v5, %v970_v43  ;;  %v978_v53 = vor.u32 %v977_v19, %v976_v9  ;;  %v979_v2 = vshll.u32 %v1513_v26, %v964_v8 }
  0xff   : > { %v912_v20 = vsub.s32 0, %v910_v59  ;;  %v980_v24 = vshrl.u32 %v1514_v34, %v965_v25  ;;  %v975_v10 = vor.u32 %v974_v35, %v973_v27  ;;  %vm982_vm1 = vcmp.lt.s32.totalorder %v963_v39, 1 }
 0x100   : > { %v827_v1 = vsel %vm744_vm12, %v826_v50, %v825_v48  ;;  %vm984_vm2 = vcmp.lt.s32.totalorder %v963_v39, 3  ;;  %vm985_vm3 = vcmp.lt.s32.totalorder %v963_v39, 4  ;;  %vm983_vm4 = vcmp.lt.s32.totalorder %v963_v39, 2 }
 0x101   : > { %v830_v22 = vsel %vm2151_vm0, %v1659_v51, %v827_v1  ;;  %v1234_v57 = vmin.u32 %v912_v20, %v910_v59  ;;  %v981_v18 = vor.u32 %v980_v24, %v979_v2  ;;  %v998_v60 = vshll.u32 %v958_v63, 8 }
 0x102   : > { %1380 = vcosq.f32 %v830_v22  ;;  %v836_v0 = vand.u32 3, %v835_v45  ;;  %v987_v6 = vsel %vm985_vm3, %v975_v10, 2102212464  ;;  %v990_v41 = vsel %vm982_vm1, %v969_v32, %v972_v17 }
 0x103   : > { %1382 = vsinq.f32 %v830_v22  ;;  %v914_v12 = vclz %v1234_v57  ;;  %v991_v16 = vsel %vm985_vm3, %v978_v53, 920167782  ;;  %v902_v26 = vadd.s32 %v2122_v58, %v2131_v42 }
 0x104   : > { %v992_v14 = vsel %vm984_vm2, %v975_v10, %v991_v16  ;;  %v994_v11 = vsel %vm982_vm1, %v972_v17, %v975_v10  ;;  %v986_v23 = vsel %vm982_vm1, %v966_v47, %v969_v32  ;;  %v988_v15 = vsel %vm984_vm2, %v972_v17, %v987_v6 }
 0x105   : > { %v1235_v34 = vadd.s32 4294967294, %v914_v12  ;;  %v993_v62 = vsel %vm983_vm4, %v990_v41, %v992_v14  ;;  %v995_v37 = vsel %vm985_vm3, %v981_v18, 1326507024  ;;  %v989_v31 = vsel %vm983_vm4, %v986_v23, %v988_v15 }
 0x106   : > { %v996_v7 = vsel %vm984_vm2, %v978_v53, %v995_v37  ;;  %v2187_v54 = vmul.u32.u64.low %v998_v60, %v993_v62  ;;  %v2188_v3 = vmul.u32.u64.high %v998_v60, %v993_v62, %v2187_v54  ;;  %vm841_vm6 = vcmp.eq.s32.totalorder %v836_v0, 2 }
 0x107   : > { %vm1236_vm5 = vcmp.lt.s32.totalorder %v1235_v34, 0  ;;  %v997_v58 = vsel %vm983_vm4, %v994_v11, %v996_v7  ;;  %vm838_vm7 = vcmp.eq.s32.totalorder %v836_v0, 0  ;;  %v1005_v48 = vmul.u32 %v998_v60, %v989_v31 }
 0x108   : > { %v917_v21 = vsel %vm1236_vm5, 0, %v1235_v34  ;;  %v2192_v29 = vmul.u32.u64.low %v998_v60, %v997_v58  ;;  %v2193_v8 = vmul.u32.u64.high %v998_v60, %v997_v58, %v2192_v29  ;;  %v1008_v56 = vadd.s32 1, %v2188_v3 }
 0x109   : > { %v918_v42 = vsub.s32 32, %v917_v21  ;;  %v919_v40 = vshll.u32 %v910_v59, %v917_v21  ;;  %v922_v28 = vsub.s32 4294967266, %v917_v21  ;;  %vm837_vm8 = vcmp.lt.s32.totalorder %v836_v0, 2 }
 0x10a   : > { %vm834_vm9 = vweird.f32 %v1659_v51  ;;  %vm1007_vm10 = vc.u32 %v2193_v8, %v2187_v54  ;;  %v932_v45 = vsub.s32 4, %v2155_v38  ;;  %vm848_vm12 = vcmp.lt.s32.totalorder %v1661_v52, 0 }
 0x10b   : > { %v920_v33 = vshrl.u32 %v902_v26, %v918_v42  ;;  %v923_v49 = vadd.s32 127, %v922_v28  ;;  %v1009_v9 = vsel %vm1007_vm10, %v1008_v56, %v2188_v3  ;;  %vm847_vm13 = vcmp.le.f32.partialorder %v846_v4, 0.7853982 }
 0x10c   : > { %v1381_v30 = vpop.eup %1380  ;;  %v1010_v59 = vadd.s32 %v1009_v9, %v1005_v48  ;;  %v933_v20 = vsel %vm848_vm12, %v932_v45, %v2155_v38  ;;  %v1006_v0 = vadd.s32 %v2187_v54, %v2193_v8  ;;  %vm938_vm1 = vweird.f32 %v1661_v52 }
 0x10d   : > { %v1383_v61 = vpop.eup %1382  ;;  %v842_v25 = vxor.u32 2147483648, %v1381_v30  ;;  %v921_v36 = vor.u32 %v920_v33, %v919_v40  ;;  %v924_v43 = vshll.u32 %v923_v49, 23  ;;  %v935_v53 = vsel %vm847_vm13, 0, %v933_v20 }
 0x10e   : > { %v839_v13 = vxor.u32 2147483648, %v1383_v61  ;;  %v1011_v63 = vadd.s32 536870912, %v1010_v59  ;;  %v939_v57 = vadd.s32 3, %v935_v53  ;;  %vm952_vm2 = vcmp.lt.s32.totalorder %v1666_v55, 0 }
 0x10f   : > { %v843_v39 = vsel %vm841_vm6, %v842_v25, %v1383_v61  ;;  %v925_v5 = vor.u32 4788187, %v924_v43  ;;  %v928_v27 = vcvt.s32.f32 %v921_v36  ;;  %vm951_vm3 = vcmp.le.f32.partialorder %v950_v44, 0.7853982 }
 0x110   : > { %v840_v46 = vsel %vm838_vm7, %v1381_v30, %v839_v13  ;;  %v1012_v51 = vshrl.u32 %v1011_v63, 30  ;;  %v940_v12 = vand.u32 3, %v939_v57  ;;  %vm1042_vm7 = vweird.f32 %v1666_v55 }
 0x111   : > { %v844_v50 = vsel %vm837_vm8, %v840_v46, %v843_v39  ;;  %v926_v19 = vand.u32 2147483647, %v925_v5 }
 0x112   : > { %v845_v35 = vsel %vm834_vm9, nan, %v844_v50  ;;  %v1013_v32 = vshll.u32 %v1012_v51, 30  ;;  %vm942_vm14 = vcmp.eq.s32.totalorder %v940_v12, 0  ;;  %vm945_vm15 = vcmp.eq.s32.totalorder %v940_v12, 2 }
 0x113   : > { %1059 = vst [vmem:[#allocation2 + $0x28] sm:$0xff] %v845_v35  ;;  %v929_v47 = vmul.f32 %v928_v27, %v926_v19  ;;  %vm941_vm0 = vcmp.lt.s32.totalorder %v940_v12, 2  ;;  %v1036_v40 = vsub.s32 4, %v1012_v51 }
 0x114   : > { %v1014_v2 = vsub.s32 %v1010_v59, %v1013_v32 }
 0x115   : > { %v930_v1 = vxor.u32 2147483648, %v929_v47  ;;  %v1037_v31 = vsel %vm952_vm2, %v1036_v40, %v1012_v51 }
 0x116   : > { %v1016_v24 = vsub.s32 0, %v1014_v2  ;;  %v1039_v30 = vsel %vm951_vm3, 0, %v1037_v31 }
 0x117   : > { %v931_v17 = vsel %vm848_vm12, %v930_v1, %v929_v47  ;;  %v1043_v33 = vadd.s32 3, %v1039_v30 }
 0x118   : > { %v934_v22 = vsel %vm847_vm13, %v1661_v52, %v931_v17  ;;  %v1238_v10 = vmin.u32 %v1016_v24, %v1014_v2 }
 0x119   : > { %1384 = vcosq.f32 %v934_v22  ;;  %v1044_v49 = vand.u32 3, %v1043_v33 }
 0x11a   : > { %1386 = vsinq.f32 %v934_v22  ;;  %v1018_v18 = vclz %v1238_v10 }
 0x11b   : > { %vm1049_vm4 = vcmp.eq.s32.totalorder %v1044_v49, 2  ;;  %vm1046_vm5 = vcmp.eq.s32.totalorder %v1044_v49, 0  ;;  %vm1045_vm6 = vcmp.lt.s32.totalorder %v1044_v49, 2 }
 0x11c   : > { %v1239_v60 = vadd.s32 4294967294, %v1018_v18 }
 0x11e   : > { %vm1240_vm11 = vcmp.lt.s32.totalorder %v1239_v60, 0 }
 0x11f   : > { %v1021_v38 = vsel %vm1240_vm11, 0, %v1239_v60 }
 0x120   : > { %v1022_v16 = vsub.s32 32, %v1021_v38  ;;  %v1023_v26 = vshll.u32 %v1014_v2, %v1021_v38  ;;  %v1026_v34 = vsub.s32 4294967266, %v1021_v38 }
 0x122   : > { %v1024_v23 = vshrl.u32 %v1006_v0, %v1022_v16  ;;  %v1027_v15 = vadd.s32 127, %v1026_v34 }
 0x123   : > { %v1385_v4 = vpop.eup %1384 }
 0x124   : > { %v1387_v6 = vpop.eup %1386  ;;  %v946_v41 = vxor.u32 2147483648, %v1385_v4  ;;  %v1025_v7 = vor.u32 %v1024_v23, %v1023_v26  ;;  %v1028_v54 = vshll.u32 %v1027_v15, 23 }
 0x125   : > { %v943_v14 = vxor.u32 2147483648, %v1387_v6 }
 0x126   : > { %v947_v11 = vsel %vm945_vm15, %v946_v41, %v1387_v6  ;;  %v1029_v21 = vor.u32 4788187, %v1028_v54  ;;  %v1032_v58 = vcvt.s32.f32 %v1025_v7 }
 0x127   : > { %v944_v62 = vsel %vm942_vm14, %v1385_v4, %v943_v14 }
 0x128   : > { %v948_v37 = vsel %vm941_vm0, %v944_v62, %v947_v11  ;;  %v1030_v42 = vand.u32 2147483647, %v1029_v21 }
 0x129   : > { %v949_v3 = vsel %vm938_vm1, nan, %v948_v37 }
 0x12a   : > { %1060 = vst [vmem:[#allocation2 + $0x30] sm:$0xff] %v949_v3  ;;  %v1033_v28 = vmul.f32 %v1032_v58, %v1030_v42 }
 0x12c   : > { %v1034_v52 = vxor.u32 2147483648, %v1033_v28 }
 0x12e   : > { %v1035_v29 = vsel %vm952_vm2, %v1034_v52, %v1033_v28 }
 0x12f   : > { %v1038_v8 = vsel %vm951_vm3, %v1666_v55, %v1035_v29 }
 0x130   : > { %1388 = vcosq.f32 %v1038_v8 }
 0x131   : > { %1390 = vsinq.f32 %v1038_v8 }
 0x13a   : > { %v1389_v56 = vpop.eup %1388 }
 0x13b   : > { %v1391_v61 = vpop.eup %1390  ;;  %v1050_v25 = vxor.u32 2147483648, %v1389_v56 }
 0x13c   : > { %v1047_v48 = vxor.u32 2147483648, %v1391_v61 }
 0x13d   : > { %v1051_v44 = vsel %vm1049_vm4, %v1050_v25, %v1391_v61 }
 0x13e   : > { %v1048_v13 = vsel %vm1046_vm5, %v1389_v56, %v1047_v48 }
 0x13f   : > { %v1052_v36 = vsel %vm1045_vm6, %v1048_v13, %v1051_v44 }
 0x140   : > { %v1053_v43 = vsel %vm1042_vm7, nan, %v1052_v36 }
 0x141   : > { %1061 = vst [vmem:[#allocation2 + $0x38] sm:$0xff] %v1053_v43 }
 0x142 PF: > { %v1062_v39 = vld [vmem:[%s1644_s4] sm:$0xff]  ;;  %v1063_v5 = vld [vmem:[%s1644_s4 + $0x8] sm:$0xff]  ;;  %v1064_v9 = vld [vmem:[%s1644_s4 + $0x10] sm:$0xff]  ;;  %s1247_s18 = sshll.u32 %s1496_s9, 10  ;;  %s1111_s29 = sshll.u32 %s1650_s27, 4  ;;  %s2231_s29 = int_to_ptr.vmem [resolvable:$true] %s1111_s29 }
 0x143   : > { %v1070_v46 = vld [vmem:[#allocation2] sm:$0xff]  ;;  %v1071_v55 = vld [vmem:[#allocation2 + $0x8] sm:$0xff]  ;;  %v1072_v50 = vld [vmem:[#allocation2 + $0x10] sm:$0xff]  ;;  %s2229_s2 = scalar_lea.hbm %s2285_s1, %s1247_s18  ;;  %s1095_s5 = scalar_lea.sflag [#allocation5], %s1640_s26 }
 0x144   : > { %v1078_v27 = vadd.f32 %v1070_v46, %v1062_v39  ;;  %v1079_v59 = vadd.f32 %v1071_v55, %v1063_v5  ;;  %v1080_v35 = vadd.f32 %v1072_v50, %v1064_v9  ;;  %v1065_v19 = vld [vmem:[%s1644_s4 + $0x18] sm:$0xff]  ;;  %v1066_v63 = vld [vmem:[%s1644_s4 + $0x20] sm:$0xff]  ;;  %v1067_v1 = vld [vmem:[%s1644_s4 + $0x28] sm:$0xff]  ;;  %s1422_s12 = scalar_lea.vmem %s2231_s29, 1024  ;;  %p2305_p11 = scmp.ne.s32.totalorder %s2289_s19, 0 }
 0x145   : > { %v1073_v45 = vld [vmem:[#allocation2 + $0x18] sm:$0xff]  ;;  %v1074_v51 = vld [vmem:[#allocation2 + $0x20] sm:$0xff]  ;;  %v1075_v20 = vld [vmem:[#allocation2 + $0x28] sm:$0xff]  ;;  %p1423_p8 = scmp.ne.s32.totalorder %s2231_s29, %s1422_s12  ;;  %s1515_s13 = smov [#allocation6]  }
 0x146   : > { %1086 = vst [vmem:[%s1650_s27] sm:$0xff] %v1078_v27  ;;  %v1081_v47 = vadd.f32 %v1073_v45, %v1065_v19  ;;  %1087 = vst [vmem:[%s1650_s27 + $0x8] sm:$0xff] %v1079_v59  ;;  %v1082_v32 = vadd.f32 %v1074_v51, %v1066_v63  ;;  %v1083_v17 = vadd.f32 %v1075_v20, %v1067_v1  ;;  %v1068_v22 = vld [vmem:[%s1644_s4 + $0x30] sm:$0xff]  ;;  %v1069_v2 = vld [vmem:[%s1644_s4 + $0x38] sm:$0xff]  ;;  %s1426_s15 = sshll.u32 %s1515_s13, 4  ;;  %s1427_s15 = int_to_ptr.vmem [resolvable:$false] %s1426_s15 }
 0x147   : > { %1088 = vst [vmem:[%s1650_s27 + $0x10] sm:$0xff] %v1080_v35  ;;  %v1076_v53 = vld [vmem:[#allocation2 + $0x30] sm:$0xff]  ;;  %p1424_p0 = pnand %p1423_p8, %p2305_p11  ;;  %s1428_s16 = scalar_lea.vmem %s1427_s15, 2048 }
 0x148   : > { %1089 = vst [vmem:[%s1650_s27 + $0x18] sm:$0xff] %v1081_v47  ;;  %v1084_v24 = vadd.f32 %v1076_v53, %v1068_v22  ;;  %v1077_v57 = vld [vmem:[#allocation2 + $0x38] sm:$0xff]  ;;  %1090 = vst [vmem:[%s1650_s27 + $0x20] sm:$0xff] %v1082_v32  ;;  %p1429_p13 = scmp.lt.s32.totalorder %s2231_s29, %s1427_s15  ;;  %p1430_p2 = scmp.lt.s32.totalorder %s1428_s16, %s1422_s12 }
 0x149   : > { %1091 = vst [vmem:[%s1650_s27 + $0x28] sm:$0xff] %v1083_v17  ;;  %v1085_v10 = vadd.f32 %v1077_v57, %v1069_v2  ;;  %p1425_p6 = pneg %p1424_p0 }
 0x14a   : > { %1092 = vst [vmem:[%s1650_s27 + $0x30] sm:$0xff] %v1084_v24  ;;  %p1431_p5 = por %p1430_p2, %p1429_p13 }
 0x14b   : > { %1093 = vst [vmem:[%s1650_s27 + $0x38] sm:$0xff] %v1085_v10 }
 0x14c   : > { %p1432_p4 = pnand %p1431_p5, %p1425_p6 }
 0x14e   : > { %1435 = shalt.err (!%p1432_p4)
}
 0x14f   : > { %s1436_s17 = scalar_lea.hbm %s2229_s2, 1024  ;;  %s1440_s24 = scalar_lea.hbm %s2285_s1, 2048 }
 0x150   : > { %p1437_p7 = scmp.ne.s32.totalorder %s2229_s2, %s1436_s17  ;;  %p1441_p1 = scmp.lt.u32.totalorder %s2229_s2, %s2285_s1 }
 0x151   : > { %p1442_p3 = scmp.lt.u32.totalorder %s1440_s24, %s1436_s17  ;;  %p1444_p8 = scmp.lt.u32.totalorder %s1436_s17, %s2229_s2 }
 0x152   : > { %p1438_p10 = pnand %p1437_p7, %p2305_p11 }
 0x153   : > { %p1443_p9 = por %p1442_p3, %p1441_p1 }
 0x154   : > { %p1439_p12 = pneg %p1438_p10 }
 0x155   : > { %p1445_p0 = por %p1444_p8, %p1443_p9 }
 0x157   : > { %p1446_p6 = pnand %p1445_p0, %p1439_p12 }
 0x159   : > { %1449 = shalt.err (!%p1446_p6)
}
 0x15a   : > { %s1516_s3 = smov 512   ;;  %s1517_s4 = smov 32  }
 0x15b   : > { %1282 = dma.vmem_to_hbm [thread:$0]  (%p2305_p11), %s2231_s29, 1024, %s2229_s2, %s1095_s5, %s1516_s3, %s1516_s3, %s1517_s4  }
 0x15c PF: > { %s1126_s27 = sand.u32 1, %s1484_s6   ;;  %p2306_p13 = scmp.ne.s32.totalorder %s2290_s21, 0 }
 0x15d   : > { %p2307_p2 = scmp.ge.s32.totalorder %s1504_s11, 2  ;;  %s1127_s18 = scalar_lea.sflag [#allocation5], %s1126_s27 }
 0x15f   : > { %p1289_p5 = pnand %p2307_p2, %p2306_p13 }
 0x161   : > { %1479 = dma.done.wait (!%p1289_p5), %s1127_s18, 1024  }
 0x162   : > { %1481 = vsyncadd (!%p1289_p5), %s1127_s18, 4294966272  ;;  %s17_s11 = sadd.s32 1, %s1504_s11   ;;  %s2308_s6 = smov %s1488_s7 }
 0x163   : > { %p14_p4 = scmp.ge.s32.totalorder %s17_s11, 4   ;;  %s2309_s7 = smov %s1492_s8 }
 0x164   : > { %s2310_s8 = smov %s1584_s20  ;;  %s2311_s9 = smov %s1500_s10 }
 0x165   : > { %s2312_s10 = smov %s2314_s14  ;;  %16 = sbr.rel (!%p14_p4) target bundleno = 6 (0x6), region = 73 }
 0x16c   :  { %1132 = vsyncpa [#allocation4], 1 }
 0x16d   :  { %1134 = vsyncpa [#allocation4 + $0x1], 1 }
 0x16e   :  { %1135 = vsyncpa [#allocation5], 1 }
 0x16f   :  { %1137 = vsyncpa [#allocation5 + $0x1], 1 }

</bundles_post_ra>
